<compile_context>
chip_gen: v7x
topology: tpu7x:2x2x1
jax: 0.10.0
libtpu: 0.0.40
codegen_flags: <defaults>
</compile_context>

<pallas_src>
import functools

import jax
import jax.numpy as jnp
import numpy as np
from jax.experimental import pallas as pl
from jax.experimental.pallas import tpu as pltpu


# ----------------------------- Pallas kernel --------------------------------

def _inception_resnet_c_kernel(activation,
                               scale_ref,                     # SMEM (1,) f32
                               x_ref,                         # (NB, H, W, C) f32
                               w0_ref, b0_ref,                # (C,48) bf16, (1,48) f32
                               w1a_ref, b1a_ref,              # (C,48) bf16, (1,48) f32
                               w1b_ref, b1b_ref,              # (144,56) bf16, (1,56) f32
                               w1c_ref, b1c_ref,              # (168,64) bf16, (1,64) f32
                               wc0_ref, wc1_ref, bc_ref,      # (48,C)/(64,C) bf16, (1,C) f32
                               o_ref):                        # (NB, H, W, C) f32
    NB, H, W, C = x_ref.shape
    relu = lambda t: jnp.maximum(t, 0.0)
    scale = scale_ref[0]

    x = x_ref[...]                                 # (NB, H, W, C) f32
    xf = x.reshape(NB * H * W, C)                  # kept f32 for the residual add
    xb = xf.astype(jnp.bfloat16)                   # bf16 matmul operand

    # ---- branch 0: 1x1 conv (BN folded) + relu -> 48 ch
    br0 = relu(jnp.dot(xb, w0_ref[...], preferred_element_type=jnp.float32)
               + b0_ref[...])

    # ---- branch 1 / stage a: 1x1 conv + relu -> 48 ch
    c1 = w1a_ref.shape[1]
    y = relu(jnp.dot(xb, w1a_ref[...], preferred_element_type=jnp.float32)
             + b1a_ref[...])
    y = y.astype(jnp.bfloat16).reshape(NB, H, W, c1)

    # ---- branch 1 / stage b: (1,3) conv, pad (0,1).
    # Stack the three W-shifted slabs along channels -> single K=3*48 matmul.
    zc = jnp.zeros((NB, H, 1, c1), jnp.bfloat16)
    left = jnp.concatenate([zc, y[:, :, :W - 1, :]], axis=2)    # tap kw=0: y[w-1]
    right = jnp.concatenate([y[:, :, 1:, :], zc], axis=2)       # tap kw=2: y[w+1]
    ystk = jnp.concatenate([left, y, right], axis=-1).reshape(NB * H * W, 3 * c1)
    c2 = w1b_ref.shape[1]
    y = relu(jnp.dot(ystk, w1b_ref[...], preferred_element_type=jnp.float32)
             + b1b_ref[...])
    y = y.astype(jnp.bfloat16).reshape(NB, H, W, c2)

    # ---- branch 1 / stage c: (3,1) conv, pad (1,0).  Same trick along H.
    zr = jnp.zeros((NB, 1, W, c2), jnp.bfloat16)
    top = jnp.concatenate([zr, y[:, :H - 1, :, :]], axis=1)     # tap kh=0: y[h-1]
    bot = jnp.concatenate([y[:, 1:, :, :], zr], axis=1)         # tap kh=2: y[h+1]
    ystk = jnp.concatenate([top, y, bot], axis=-1).reshape(NB * H * W, 3 * c2)
    br1 = relu(jnp.dot(ystk, w1c_ref[...], preferred_element_type=jnp.float32)
               + b1c_ref[...])

    # ---- final 1x1 conv over concat([br0, br1]): two matmuls split at 48|64
    res = (jnp.dot(br0.astype(jnp.bfloat16), wc0_ref[...],
                   preferred_element_type=jnp.float32)
           + jnp.dot(br1.astype(jnp.bfloat16), wc1_ref[...],
                     preferred_element_type=jnp.float32)
           + bc_ref[...])

    out = xf + scale * res
    if activation:
        out = relu(out)
    o_ref[...] = out.reshape(NB, H, W, C)


# ------------------------------- wrappers ------------------------------------

def _pick_block_batch(n, hw, target_rows=256):
    """Largest divisor of n with block_batch*hw <= ~target_rows (>=1)."""
    nb = max(1, min(n, max(1, target_rows // max(hw, 1))))
    while n % nb:
        nb -= 1
    return max(nb, 1)


def inception_resnet_c_quart_nhwc(x_nhwc, params, *, scale=1.0, activation=True):
    """Production entry point: NHWC in, NHWC out (no layout transposes)."""
    x = x_nhwc.astype(jnp.float32)
    N, H, W, C = x.shape
    NB = _pick_block_batch(N, H * W)
    scale_arr = jnp.asarray([scale], jnp.float32)

    def resident(p):  # full-array block, constant index_map -> stays in VMEM
        return pl.BlockSpec(p.shape, lambda n, _nd=p.ndim: (0,) * _nd)

    in_specs = [
        pl.BlockSpec(memory_space=pltpu.MemorySpace.SMEM),        # scale
        pl.BlockSpec((NB, H, W, C), lambda n: (n, 0, 0, 0)),      # x (batch-tiled)
        resident(params["w0"]), resident(params["b0"]),
        resident(params["w1a"]), resident(params["b1a"]),
        resident(params["w1b"]), resident(params["b1b"]),
        resident(params["w1c"]), resident(params["b1c"]),
        resident(params["wc0"]), resident(params["wc1"]), resident(params["bc"]),
    ]

    out = pl.pallas_call(
        functools.partial(_inception_resnet_c_kernel, bool(activation)),
        grid=(N // NB,),
        out_shape=jax.ShapeDtypeStruct((N, H, W, C), jnp.float32),
        in_specs=in_specs,
        out_specs=pl.BlockSpec((NB, H, W, C), lambda n: (n, 0, 0, 0)),
        compiler_params=pltpu.CompilerParams(
            dimension_semantics=("parallel",),
            vmem_limit_bytes=32 * 1024 * 1024),
    )(scale_arr, x,
      params["w0"], params["b0"],
      params["w1a"], params["b1a"],
      params["w1b"], params["b1b"],
      params["w1c"], params["b1c"],
      params["wc0"], params["wc1"], params["bc"])
    return out


def inception_resnet_c_quart(x_nchw, params, *, scale=1.0, activation=True):
    """NCHW shim (only for comparing against the PyTorch-layout reference)."""
    x = jnp.transpose(x_nchw, (0, 2, 3, 1))
    out = inception_resnet_c_quart_nhwc(x, params, scale=scale, activation=activation)
    return jnp.transpose(out, (0, 3, 1, 2))


# ------------------------ parameter construction -----------------------------

_BN_EPS = 1e-3


def make_params(key, in_channels):
    """Deterministic synthetic parameters. Returns (raw torch-layout params,
    kernel-ready folded bf16 params)."""
    ks = jax.random.split(key, 10)

    def conv_w(k, o, i, kh, kw):
        return jax.random.normal(k, (o, i, kh, kw), jnp.float32) * 0.1

    def bn_params(k, c):
        k1, k2, k3, k4 = jax.random.split(k, 4)
        gamma = jax.random.uniform(k1, (c,), jnp.float32, 0.5, 1.5)
        beta = jax.random.normal(k2, (c,), jnp.float32) * 0.1
        mean = jax.random.normal(k3, (c,), jnp.float32) * 0.1
        var = jax.random.uniform(k4, (c,), jnp.float32, 0.5, 1.5)
        return gamma, beta, mean, var

    raw = {
        "w0": conv_w(ks[0], 48, in_channels, 1, 1), "bn0": bn_params(ks[1], 48),
        "w1a": conv_w(ks[2], 48, in_channels, 1, 1), "bn1a": bn_params(ks[3], 48),
        "w1b": conv_w(ks[4], 56, 48, 1, 3), "bn1b": bn_params(ks[5], 56),
        "w1c": conv_w(ks[6], 64, 56, 3, 1), "bn1c": bn_params(ks[7], 64),
        "wc": conv_w(ks[8], in_channels, 112, 1, 1),
        "bc": jax.random.normal(ks[9], (in_channels,), jnp.float32) * 0.1,
    }

    def fold(w, bn):  # fold BatchNorm (inference) into conv weight + bias
        gamma, beta, mean, var = bn
        s = gamma / jnp.sqrt(var + _BN_EPS)
        return w * s[:, None, None, None], beta - mean * s

    w0f, b0f = fold(raw["w0"], raw["bn0"])
    w1af, b1af = fold(raw["w1a"], raw["bn1a"])
    w1bf, b1bf = fold(raw["w1b"], raw["bn1b"])
    w1cf, b1cf = fold(raw["w1c"], raw["bn1c"])

    bf16 = lambda a: a.astype(jnp.bfloat16)
    folded = {
        # 1x1 convs as (Cin, Cout) bf16 matmul weights, biases (1, Cout) f32
        "w0": bf16(jnp.transpose(w0f[:, :, 0, 0])), "b0": b0f[None, :],
        "w1a": bf16(jnp.transpose(w1af[:, :, 0, 0])), "b1a": b1af[None, :],
        # (1,3) conv -> stacked-K (3*48, 56); row index = kw*48 + ci
        "w1b": bf16(jnp.transpose(w1bf[:, :, 0, :], (2, 1, 0)).reshape(3 * 48, 56)),
        "b1b": b1bf[None, :],
        # (3,1) conv -> stacked-K (3*56, 64); row index = kh*56 + ci
        "w1c": bf16(jnp.transpose(w1cf[:, :, :, 0], (2, 1, 0)).reshape(3 * 56, 64)),
        "b1c": b1cf[None, :],
        # final 1x1 conv split over the concat boundary (48 | 64)
        "wc0": bf16(jnp.transpose(raw["wc"][:, :48, 0, 0])),
        "wc1": bf16(jnp.transpose(raw["wc"][:, 48:, 0, 0])),
        "bc": raw["bc"][None, :],
    }
    return raw, folded


# ------------------------ pure-JAX reference (NCHW) ---------------------------

def ref_forward(x, raw, *, scale=1.0, activation=True):
    def conv(v, w, padding):
        return jax.lax.conv_general_dilated(
            v, w, (1, 1), padding, dimension_numbers=("NCHW", "OIHW", "NCHW"))

    def block(v, w, bn, padding):
        gamma, beta, mean, var = bn
        y = conv(v, w, padding)
        y = ((y - mean[None, :, None, None])
             / jnp.sqrt(var[None, :, None, None] + _BN_EPS)
             * gamma[None, :, None, None] + beta[None, :, None, None])
        return jnp.maximum(y, 0.0)

    b0 = block(x, raw["w0"], raw["bn0"], "VALID")
    b1 = block(x, raw["w1a"], raw["bn1a"], "VALID")
    b1 = block(b1, raw["w1b"], raw["bn1b"], ((0, 0), (1, 1)))
    b1 = block(b1, raw["w1c"], raw["bn1c"], ((1, 1), (0, 0)))
    xr = jnp.concatenate([b0, b1], axis=1)
    xr = conv(xr, raw["wc"], "VALID") + raw["bc"][None, :, None, None]
    out = x + scale * xr
    return jnp.maximum(out, 0.0) if activation else out


# --------------------------------- main ---------------------------------------

if __name__ == "__main__":
    key = jax.random.PRNGKey(0)
    k_x, k_p = jax.random.split(key)

    N, C, H, W = 2, 32, 8, 8
    scale = 0.2
    x = jax.random.normal(k_x, (N, C, H, W), jnp.float32)
    raw, folded = make_params(k_p, C)

    out = inception_resnet_c_quart(x, folded, scale=scale, activation=True)
    out = jax.block_until_ready(out)

    ref = jax.block_until_ready(ref_forward(x, raw, scale=scale, activation=True))
    # bf16 matmul operands (f32 accumulation) -> slightly relaxed tolerance.
    np.testing.assert_allclose(np.asarray(out), np.asarray(ref), rtol=2e-2, atol=2e-2)

    print("KERNEL_OK")
</pallas_src>

<mosaic_0001>
module attributes {stable_mosaic.version = 11 : i64} {
  func.func @_inception_resnet_c_kernel(%arg0: i32, %arg1: memref<1xf32, #tpu.memory_space<smem>>, %arg2: memref<2x8x8x32xf32, #tpu.memory_space<vmem>>, %arg3: memref<32x48xbf16, #tpu.memory_space<vmem>>, %arg4: memref<1x48xf32, #tpu.memory_space<vmem>>, %arg5: memref<32x48xbf16, #tpu.memory_space<vmem>>, %arg6: memref<1x48xf32, #tpu.memory_space<vmem>>, %arg7: memref<144x56xbf16, #tpu.memory_space<vmem>>, %arg8: memref<1x56xf32, #tpu.memory_space<vmem>>, %arg9: memref<168x64xbf16, #tpu.memory_space<vmem>>, %arg10: memref<1x64xf32, #tpu.memory_space<vmem>>, %arg11: memref<48x32xbf16, #tpu.memory_space<vmem>>, %arg12: memref<64x32xbf16, #tpu.memory_space<vmem>>, %arg13: memref<1x32xf32, #tpu.memory_space<vmem>>, %arg14: memref<2x8x8x32xf32, #tpu.memory_space<vmem>>) attributes {dimension_semantics = [#tpu.dimension_semantics<parallel>], iteration_bounds = array<i64: 1>, scalar_prefetch = 0 : i64, scratch_operands = 0 : i64, tpu.core_type = #tpu.core_type<tc>, window_params = [{transform_indices = @transform_0, window_bounds = array<i64: 1>}, {transform_indices = @transform_1, window_bounds = array<i64: 2, 8, 8, 32>}, {pipeline_mode = #tpu.pipeline_mode<synchronous>, transform_indices = @transform_2, window_bounds = array<i64: 32, 48>}, {pipeline_mode = #tpu.pipeline_mode<synchronous>, transform_indices = @transform_3, window_bounds = array<i64: 1, 48>}, {pipeline_mode = #tpu.pipeline_mode<synchronous>, transform_indices = @transform_4, window_bounds = array<i64: 32, 48>}, {pipeline_mode = #tpu.pipeline_mode<synchronous>, transform_indices = @transform_5, window_bounds = array<i64: 1, 48>}, {pipeline_mode = #tpu.pipeline_mode<synchronous>, transform_indices = @transform_6, window_bounds = array<i64: 144, 56>}, {pipeline_mode = #tpu.pipeline_mode<synchronous>, transform_indices = @transform_7, window_bounds = array<i64: 1, 56>}, {pipeline_mode = #tpu.pipeline_mode<synchronous>, transform_indices = @transform_8, window_bounds = array<i64: 168, 64>}, {pipeline_mode = #tpu.pipeline_mode<synchronous>, transform_indices = @transform_9, window_bounds = array<i64: 1, 64>}, {pipeline_mode = #tpu.pipeline_mode<synchronous>, transform_indices = @transform_10, window_bounds = array<i64: 48, 32>}, {pipeline_mode = #tpu.pipeline_mode<synchronous>, transform_indices = @transform_11, window_bounds = array<i64: 64, 32>}, {pipeline_mode = #tpu.pipeline_mode<synchronous>, transform_indices = @transform_12, window_bounds = array<i64: 1, 32>}, {transform_indices = @transform_13, window_bounds = array<i64: 2, 8, 8, 32>}]} {
    %c0 = arith.constant 0 : index
    %0 = memref.load %arg1[%c0] : memref<1xf32, #tpu.memory_space<smem>>
    %c0_0 = arith.constant 0 : index
    %c0_1 = arith.constant 0 : index
    %c0_2 = arith.constant 0 : index
    %c0_3 = arith.constant 0 : index
    %1 = vector.load %arg2[%c0_0, %c0_1, %c0_2, %c0_3] : memref<2x8x8x32xf32, #tpu.memory_space<vmem>>, vector<2x8x8x32xf32>
    %2 = vector.shape_cast %1 : vector<2x8x8x32xf32> to vector<128x32xf32>
    %3 = arith.truncf %2 : vector<128x32xf32> to vector<128x32xbf16>
    %c0_4 = arith.constant 0 : index
    %c0_5 = arith.constant 0 : index
    %4 = vector.load %arg3[%c0_4, %c0_5] : memref<32x48xbf16, #tpu.memory_space<vmem>>, vector<32x48xbf16>
    %cst = arith.constant dense<0.000000e+00> : vector<128x48xf32>
    %5 = tpu.matmul %3, %4, %cst {dimension_numbers = #tpu.dot_dimension_numbers<[1], [0], [0], [1], [0, 0, 1, 1], [], []>} : vector<128x32xbf16>, vector<32x48xbf16>, vector<128x48xf32> -> vector<128x48xf32>
    %c0_6 = arith.constant 0 : index
    %c0_7 = arith.constant 0 : index
    %6 = vector.load %arg4[%c0_6, %c0_7] : memref<1x48xf32, #tpu.memory_space<vmem>>, vector<1x48xf32>
    %7 = vector.broadcast %6 : vector<1x48xf32> to vector<128x48xf32>
    %8 = arith.addf %5, %7 : vector<128x48xf32>
    %cst_8 = arith.constant 0.000000e+00 : f32
    %9 = vector.broadcast %cst_8 : f32 to vector<128x48xf32>
    %10 = arith.maximumf %8, %9 : vector<128x48xf32>
    %c0_9 = arith.constant 0 : index
    %c0_10 = arith.constant 0 : index
    %11 = vector.load %arg5[%c0_9, %c0_10] : memref<32x48xbf16, #tpu.memory_space<vmem>>, vector<32x48xbf16>
    %cst_11 = arith.constant dense<0.000000e+00> : vector<128x48xf32>
    %12 = tpu.matmul %3, %11, %cst_11 {dimension_numbers = #tpu.dot_dimension_numbers<[1], [0], [0], [1], [0, 0, 1, 1], [], []>} : vector<128x32xbf16>, vector<32x48xbf16>, vector<128x48xf32> -> vector<128x48xf32>
    %c0_12 = arith.constant 0 : index
    %c0_13 = arith.constant 0 : index
    %13 = vector.load %arg6[%c0_12, %c0_13] : memref<1x48xf32, #tpu.memory_space<vmem>>, vector<1x48xf32>
    %14 = vector.broadcast %13 : vector<1x48xf32> to vector<128x48xf32>
    %15 = arith.addf %12, %14 : vector<128x48xf32>
    %cst_14 = arith.constant 0.000000e+00 : f32
    %16 = vector.broadcast %cst_14 : f32 to vector<128x48xf32>
    %17 = arith.maximumf %15, %16 : vector<128x48xf32>
    %18 = arith.truncf %17 : vector<128x48xf32> to vector<128x48xbf16>
    %19 = vector.shape_cast %18 : vector<128x48xbf16> to vector<2x8x8x48xbf16>
    %cst_15 = arith.constant 0.000000e+00 : bf16
    %20 = vector.broadcast %cst_15 : bf16 to vector<2x8x1x48xbf16>
    %21 = vector.extract_strided_slice %19 {offsets = [0, 0, 0, 0], sizes = [2, 8, 7, 48], strides = [1, 1, 1, 1]} : vector<2x8x8x48xbf16> to vector<2x8x7x48xbf16>
    %22 = tpu.concatenate %20, %21 in 2 : vector<2x8x1x48xbf16>, vector<2x8x7x48xbf16> -> vector<2x8x8x48xbf16>
    %23 = vector.extract_strided_slice %19 {offsets = [0, 0, 1, 0], sizes = [2, 8, 7, 48], strides = [1, 1, 1, 1]} : vector<2x8x8x48xbf16> to vector<2x8x7x48xbf16>
    %24 = tpu.concatenate %23, %20 in 2 : vector<2x8x7x48xbf16>, vector<2x8x1x48xbf16> -> vector<2x8x8x48xbf16>
    %25 = tpu.concatenate %22, %19, %24 in 3 : vector<2x8x8x48xbf16>, vector<2x8x8x48xbf16>, vector<2x8x8x48xbf16> -> vector<2x8x8x144xbf16>
    %26 = vector.shape_cast %25 : vector<2x8x8x144xbf16> to vector<128x144xbf16>
    %c0_16 = arith.constant 0 : index
    %c0_17 = arith.constant 0 : index
    %27 = vector.load %arg7[%c0_16, %c0_17] : memref<144x56xbf16, #tpu.memory_space<vmem>>, vector<144x56xbf16>
    %cst_18 = arith.constant dense<0.000000e+00> : vector<128x56xf32>
    %28 = tpu.matmul %26, %27, %cst_18 {dimension_numbers = #tpu.dot_dimension_numbers<[1], [0], [0], [1], [0, 0, 1, 1], [], []>} : vector<128x144xbf16>, vector<144x56xbf16>, vector<128x56xf32> -> vector<128x56xf32>
    %c0_19 = arith.constant 0 : index
    %c0_20 = arith.constant 0 : index
    %29 = vector.load %arg8[%c0_19, %c0_20] : memref<1x56xf32, #tpu.memory_space<vmem>>, vector<1x56xf32>
    %30 = vector.broadcast %29 : vector<1x56xf32> to vector<128x56xf32>
    %31 = arith.addf %28, %30 : vector<128x56xf32>
    %cst_21 = arith.constant 0.000000e+00 : f32
    %32 = vector.broadcast %cst_21 : f32 to vector<128x56xf32>
    %33 = arith.maximumf %31, %32 : vector<128x56xf32>
    %34 = arith.truncf %33 : vector<128x56xf32> to vector<128x56xbf16>
    %35 = vector.shape_cast %34 : vector<128x56xbf16> to vector<2x8x8x56xbf16>
    %cst_22 = arith.constant 0.000000e+00 : bf16
    %36 = vector.broadcast %cst_22 : bf16 to vector<2x1x8x56xbf16>
    %37 = vector.extract_strided_slice %35 {offsets = [0, 0, 0, 0], sizes = [2, 7, 8, 56], strides = [1, 1, 1, 1]} : vector<2x8x8x56xbf16> to vector<2x7x8x56xbf16>
    %38 = tpu.concatenate %36, %37 in 1 : vector<2x1x8x56xbf16>, vector<2x7x8x56xbf16> -> vector<2x8x8x56xbf16>
    %39 = vector.extract_strided_slice %35 {offsets = [0, 1, 0, 0], sizes = [2, 7, 8, 56], strides = [1, 1, 1, 1]} : vector<2x8x8x56xbf16> to vector<2x7x8x56xbf16>
    %40 = tpu.concatenate %39, %36 in 1 : vector<2x7x8x56xbf16>, vector<2x1x8x56xbf16> -> vector<2x8x8x56xbf16>
    %41 = tpu.concatenate %38, %35, %40 in 3 : vector<2x8x8x56xbf16>, vector<2x8x8x56xbf16>, vector<2x8x8x56xbf16> -> vector<2x8x8x168xbf16>
    %42 = vector.shape_cast %41 : vector<2x8x8x168xbf16> to vector<128x168xbf16>
    %c0_23 = arith.constant 0 : index
    %c0_24 = arith.constant 0 : index
    %43 = vector.load %arg9[%c0_23, %c0_24] : memref<168x64xbf16, #tpu.memory_space<vmem>>, vector<168x64xbf16>
    %cst_25 = arith.constant dense<0.000000e+00> : vector<128x64xf32>
    %44 = tpu.matmul %42, %43, %cst_25 {dimension_numbers = #tpu.dot_dimension_numbers<[1], [0], [0], [1], [0, 0, 1, 1], [], []>} : vector<128x168xbf16>, vector<168x64xbf16>, vector<128x64xf32> -> vector<128x64xf32>
    %c0_26 = arith.constant 0 : index
    %c0_27 = arith.constant 0 : index
    %45 = vector.load %arg10[%c0_26, %c0_27] : memref<1x64xf32, #tpu.memory_space<vmem>>, vector<1x64xf32>
    %46 = vector.broadcast %45 : vector<1x64xf32> to vector<128x64xf32>
    %47 = arith.addf %44, %46 : vector<128x64xf32>
    %cst_28 = arith.constant 0.000000e+00 : f32
    %48 = vector.broadcast %cst_28 : f32 to vector<128x64xf32>
    %49 = arith.maximumf %47, %48 : vector<128x64xf32>
    %50 = arith.truncf %10 : vector<128x48xf32> to vector<128x48xbf16>
    %c0_29 = arith.constant 0 : index
    %c0_30 = arith.constant 0 : index
    %51 = vector.load %arg11[%c0_29, %c0_30] : memref<48x32xbf16, #tpu.memory_space<vmem>>, vector<48x32xbf16>
    %cst_31 = arith.constant dense<0.000000e+00> : vector<128x32xf32>
    %52 = tpu.matmul %50, %51, %cst_31 {dimension_numbers = #tpu.dot_dimension_numbers<[1], [0], [0], [1], [0, 0, 1, 1], [], []>} : vector<128x48xbf16>, vector<48x32xbf16>, vector<128x32xf32> -> vector<128x32xf32>
    %53 = arith.truncf %49 : vector<128x64xf32> to vector<128x64xbf16>
    %c0_32 = arith.constant 0 : index
    %c0_33 = arith.constant 0 : index
    %54 = vector.load %arg12[%c0_32, %c0_33] : memref<64x32xbf16, #tpu.memory_space<vmem>>, vector<64x32xbf16>
    %cst_34 = arith.constant dense<0.000000e+00> : vector<128x32xf32>
    %55 = tpu.matmul %53, %54, %cst_34 {dimension_numbers = #tpu.dot_dimension_numbers<[1], [0], [0], [1], [0, 0, 1, 1], [], []>} : vector<128x64xbf16>, vector<64x32xbf16>, vector<128x32xf32> -> vector<128x32xf32>
    %56 = arith.addf %52, %55 : vector<128x32xf32>
    %c0_35 = arith.constant 0 : index
    %c0_36 = arith.constant 0 : index
    %57 = vector.load %arg13[%c0_35, %c0_36] : memref<1x32xf32, #tpu.memory_space<vmem>>, vector<1x32xf32>
    %58 = vector.broadcast %57 : vector<1x32xf32> to vector<128x32xf32>
    %59 = arith.addf %56, %58 : vector<128x32xf32>
    %60 = vector.broadcast %0 : f32 to vector<128x32xf32>
    %61 = arith.mulf %60, %59 : vector<128x32xf32>
    %62 = arith.addf %2, %61 : vector<128x32xf32>
    %cst_37 = arith.constant 0.000000e+00 : f32
    %63 = vector.broadcast %cst_37 : f32 to vector<128x32xf32>
    %64 = arith.maximumf %62, %63 : vector<128x32xf32>
    %65 = vector.shape_cast %64 : vector<128x32xf32> to vector<2x8x8x32xf32>
    %c0_38 = arith.constant 0 : index
    %c0_39 = arith.constant 0 : index
    %c0_40 = arith.constant 0 : index
    %c0_41 = arith.constant 0 : index
    %66 = vector.load %arg14[%c0_38, %c0_39, %c0_40, %c0_41] : memref<2x8x8x32xf32, #tpu.memory_space<vmem>>, vector<2x8x8x32xf32>
    tpu.vector_store %arg14[%c0_38, %c0_39, %c0_40, %c0_41], %65 {strides = array<i32>} : memref<2x8x8x32xf32, #tpu.memory_space<vmem>>, vector<2x8x8x32xf32>,
    return
  }
  func.func @transform_0(%arg0: i32) -> i32 {
    %c0_i32 = arith.constant 0 : i32
    %c0_i32_0 = arith.constant 0 : i32
    return %c0_i32 : i32
  }
  func.func @transform_1(%arg0: i32) -> (i32, i32, i32, i32) {
    %c0_i32 = arith.constant 0 : i32
    %c0_i32_0 = arith.constant 0 : i32
    %c0_i32_1 = arith.constant 0 : i32
    %c0_i32_2 = arith.constant 0 : i32
    return %arg0, %c0_i32, %c0_i32_0, %c0_i32_1 : i32, i32, i32, i32
  }
  func.func @transform_2(%arg0: i32) -> (i32, i32) {
    %c0_i32 = arith.constant 0 : i32
    %c0_i32_0 = arith.constant 0 : i32
    %c0_i32_1 = arith.constant 0 : i32
    return %c0_i32, %c0_i32_0 : i32, i32
  }
  func.func @transform_3(%arg0: i32) -> (i32, i32) {
    %c0_i32 = arith.constant 0 : i32
    %c0_i32_0 = arith.constant 0 : i32
    %c0_i32_1 = arith.constant 0 : i32
    return %c0_i32, %c0_i32_0 : i32, i32
  }
  func.func @transform_4(%arg0: i32) -> (i32, i32) {
    %c0_i32 = arith.constant 0 : i32
    %c0_i32_0 = arith.constant 0 : i32
    %c0_i32_1 = arith.constant 0 : i32
    return %c0_i32, %c0_i32_0 : i32, i32
  }
  func.func @transform_5(%arg0: i32) -> (i32, i32) {
    %c0_i32 = arith.constant 0 : i32
    %c0_i32_0 = arith.constant 0 : i32
    %c0_i32_1 = arith.constant 0 : i32
    return %c0_i32, %c0_i32_0 : i32, i32
  }
  func.func @transform_6(%arg0: i32) -> (i32, i32) {
    %c0_i32 = arith.constant 0 : i32
    %c0_i32_0 = arith.constant 0 : i32
    %c0_i32_1 = arith.constant 0 : i32
    return %c0_i32, %c0_i32_0 : i32, i32
  }
  func.func @transform_7(%arg0: i32) -> (i32, i32) {
    %c0_i32 = arith.constant 0 : i32
    %c0_i32_0 = arith.constant 0 : i32
    %c0_i32_1 = arith.constant 0 : i32
    return %c0_i32, %c0_i32_0 : i32, i32
  }
  func.func @transform_8(%arg0: i32) -> (i32, i32) {
    %c0_i32 = arith.constant 0 : i32
    %c0_i32_0 = arith.constant 0 : i32
    %c0_i32_1 = arith.constant 0 : i32
    return %c0_i32, %c0_i32_0 : i32, i32
  }
  func.func @transform_9(%arg0: i32) -> (i32, i32) {
    %c0_i32 = arith.constant 0 : i32
    %c0_i32_0 = arith.constant 0 : i32
    %c0_i32_1 = arith.constant 0 : i32
    return %c0_i32, %c0_i32_0 : i32, i32
  }
  func.func @transform_10(%arg0: i32) -> (i32, i32) {
    %c0_i32 = arith.constant 0 : i32
    %c0_i32_0 = arith.constant 0 : i32
    %c0_i32_1 = arith.constant 0 : i32
    return %c0_i32, %c0_i32_0 : i32, i32
  }
  func.func @transform_11(%arg0: i32) -> (i32, i32) {
    %c0_i32 = arith.constant 0 : i32
    %c0_i32_0 = arith.constant 0 : i32
    %c0_i32_1 = arith.constant 0 : i32
    return %c0_i32, %c0_i32_0 : i32, i32
  }
  func.func @transform_12(%arg0: i32) -> (i32, i32) {
    %c0_i32 = arith.constant 0 : i32
    %c0_i32_0 = arith.constant 0 : i32
    %c0_i32_1 = arith.constant 0 : i32
    return %c0_i32, %c0_i32_0 : i32, i32
  }
  func.func @transform_13(%arg0: i32) -> (i32, i32, i32, i32) {
    %c0_i32 = arith.constant 0 : i32
    %c0_i32_0 = arith.constant 0 : i32
    %c0_i32_1 = arith.constant 0 : i32
    %c0_i32_2 = arith.constant 0 : i32
    return %arg0, %c0_i32, %c0_i32_0, %c0_i32_1 : i32, i32, i32, i32
  }
}

</mosaic_0001>

<bundles_post_ra>
// kernel: tpu_custom_call.1
= control target key start
LH: loop header
LB: loop body
LE: loop exit
PB: predicated region body
PF: predicated region fallthrough
CT: control target
= control target key end

     0   :  { %vm95_vm0 = vcmask 261120   ;;  %s3392_s0 = inlined_call_operand.<no memory space> [shape: f32[1], index: 0, kind: input, shape index: {}]   ;;  %s3393_s1 = inlined_call_operand.vmem [shape: f32[2,8,8,32], index: 1, kind: input, shape index: {}]   ;;  %s3394_s2 = inlined_call_operand.vmem [shape: bf16[32,48], index: 2, kind: input, shape index: {}]   ;;  %s3395_s3 = inlined_call_operand.vmem [shape: f32[1,48], index: 3, kind: input, shape index: {}]   ;;  %s3396_s4 = inlined_call_operand.vmem [shape: bf16[32,48], index: 4, kind: input, shape index: {}]   ;;  %s3397_s5 = inlined_call_operand.vmem [shape: f32[1,48], index: 5, kind: input, shape index: {}]   ;;  %s3398_s6 = inlined_call_operand.vmem [shape: bf16[144,56], index: 6, kind: input, shape index: {}]   ;;  %s3399_s7 = inlined_call_operand.vmem [shape: f32[1,56], index: 7, kind: input, shape index: {}]   ;;  %s3400_s8 = inlined_call_operand.vmem [shape: bf16[168,64], index: 8, kind: input, shape index: {}]   ;;  %s3401_s9 = inlined_call_operand.vmem [shape: f32[1,64], index: 9, kind: input, shape index: {}]   ;;  %s3402_s10 = inlined_call_operand.vmem [shape: bf16[48,32], index: 10, kind: input, shape index: {}]   ;;  %s3403_s11 = inlined_call_operand.vmem [shape: bf16[64,32], index: 11, kind: input, shape index: {}]   ;;  %s3404_s12 = inlined_call_operand.vmem [shape: f32[1,32], index: 12, kind: input, shape index: {}]   ;;  %s3405_s13 = inlined_call_operand.hbm [shape: f32[2,8,8,32], index: 13, kind: output, shape index: {}]  }
   0x1   :  { %v2332_v0 = vld [vmem:[%s3396_s4] sm:$0xff]   ;;  %v2333_v1 = vld [vmem:[%s3396_s4 + $0x8] sm:$0xff]   ;;  %v50_v5 = vld [vmem:[%s3393_s1 + $0x10] sm:$0xff] }
   0x2   :  { %2242 = vmatprep.subr.bf16.mxu1 %v2332_v0  ;;  %v48_v2 = vld [vmem:[%s3393_s1] sm:$0xff]  ;;  %v49_v3 = vld [vmem:[%s3393_s1 + $0x8] sm:$0xff]  ;;  %v51_v6 = vld [vmem:[%s3393_s1 + $0x18] sm:$0xff] }
   0x3   :  { %2243 = vmatpush3.bf16.msra.mxu1 %v2332_v0  ;;  %v64_v4 = vpack.c.bf16 %v49_v3, %v48_v2  ;;  %v52_v7 = vld [vmem:[%s3393_s1 + $0x20] sm:$0xff]  ;;  %v53_v8 = vld [vmem:[%s3393_s1 + $0x28] sm:$0xff]  ;;  %v65_v9 = vpack.c.bf16 %v51_v6, %v50_v5  ;;  %v54_v11 = vld [vmem:[%s3393_s1 + $0x30] sm:$0xff] }
   0x4   :  { %2244 = vmatprep.subr.bf16.mxu1 %v2333_v1  ;;  %v66_v10 = vpack.c.bf16 %v53_v8, %v52_v7  ;;  %v55_v12 = vld [vmem:[%s3393_s1 + $0x38] sm:$0xff]  ;;  %v56_v13 = vld [vmem:[%s3393_s1 + $0x40] sm:$0xff]  ;;  %v57_v14 = vld [vmem:[%s3393_s1 + $0x48] sm:$0xff] }
   0x5   :  { %2246 = vmatprep.mubr.msk.bf16.mxu1 %vm95_vm0, %v64_v4  ;;  %2226 = vmatprep.mubr.msk.bf16.mxu0 %vm95_vm0, %v64_v4  ;;  %v67_v15 = vpack.c.bf16 %v55_v12, %v54_v11  ;;  %v68_v16 = vpack.c.bf16 %v57_v14, %v56_v13  ;;  %v58_v17 = vld [vmem:[%s3393_s1 + $0x50] sm:$0xff]  ;;  %v59_v18 = vld [vmem:[%s3393_s1 + $0x58] sm:$0xff]  ;;  %v60_v19 = vld [vmem:[%s3393_s1 + $0x60] sm:$0xff] }
   0x6   :  { %v61_v20 = vld [vmem:[%s3393_s1 + $0x68] sm:$0xff]  ;;  %v69_v21 = vpack.c.bf16 %v59_v18, %v58_v17 }
   0x7   :  { %2245 = vmatpush3.bf16.msra.mxu1 %v2333_v1  ;;  %v70_v22 = vpack.c.bf16 %v61_v20, %v60_v19 }
   0xa   :  { %2247 = vmatmul.mubr.msk.bf16.vlgmr.msra.gmra.mrb[0].mxu1 %vm95_vm0, %v65_v9 }
   0xb   :  { %2250 = vmatprep.mubr.msk.bf16.mxu1 %vm95_vm0, %v66_v10 }
  0x12   :  { %2251 = vmatmul.mubr.msk.bf16.gmra.mrb[4].mxu1 %vm95_vm0, %v67_v15 }
  0x13   :  { %2254 = vmatprep.mubr.msk.bf16.mxu1 %vm95_vm0, %v68_v16 }
  0x1a   :  { %2255 = vmatmul.mubr.msk.bf16.gmra.mrb[8].mxu1 %vm95_vm0, %v69_v21 }
  0x1b   :  { %19 = vsyncpa [#allocation4], 0  ;;  %2258 = vmatprep.mubr.msk.bf16.mxu1 %vm95_vm0, %v70_v22  ;;  %v62_v23 = vld [vmem:[%s3393_s1 + $0x70] sm:$0xff]  ;;  %v63_v24 = vld [vmem:[%s3393_s1 + $0x78] sm:$0xff]  ;;  %v2403_v28 = vmov 0   ;;  %s2404_s29 = smov 48  }
  0x1c   :  { %v71_v25 = vpack.c.bf16 %v63_v24, %v62_v23  ;;  %v2334_v26 = vld [vmem:[%s3394_s2] sm:$0xff]   ;;  %v2335_v27 = vld [vmem:[%s3394_s2 + $0x8] sm:$0xff]   ;;  %1466 = vmatprep.subr.bf16.mxu1 %v2403_v28  ;;  %v2338_v31 = vld [vmem:[%s3398_s6 + $0x10] sm:$0xff]   ;;  %vm612_vm1 = vcmask 1043456   ;;  %vm613_vm2 = vsmask.f32 3328 }
  0x1d   :  { %2222 = vmatprep.subr.bf16.mxu0 %v2334_v26  ;;  %v2336_v29 = vld [vmem:[%s3398_s6] sm:$0xff]   ;;  %v2337_v30 = vld [vmem:[%s3398_s6 + $0x8] sm:$0xff]   ;;  %v2339_v32 = vld [vmem:[%s3398_s6 + $0x18] sm:$0xff]   ;;  %vm545_vm4 = vcmask 1040384   ;;  %vm546_vm5 = vsmask.f32 256 }
  0x1e   :  { %2223 = vmatpush3.bf16.msra.mxu0 %v2334_v26  ;;  %v2340_v33 = vld [vmem:[%s3398_s6 + $0x20] sm:$0xff]   ;;  %v2341_v34 = vld [vmem:[%s3398_s6 + $0x28] sm:$0xff]   ;;  %v2342_v36 = vld [vmem:[%s3398_s6 + $0x30] sm:$0xff]   ;;  %vm711_vm7 = vcmask 392192   ;;  %vm760_vm8 = vcmask 785408   ;;  %vm944_vm9 = vcmask 130048  }
  0x1f   :  { %2224 = vmatprep.subr.bf16.mxu0 %v2335_v27  ;;  %v2585_v35 = vld [vmem:[%s3397_s5] ss:$0 sm:$0xff]  ;;  %v2343_v45 = vld [vmem:[%s3398_s6 + $0x38] sm:$0xff]   ;;  %vm2622_vm3 = vmand %vm612_vm1, %vm613_vm2  ;;  %vm1195_vm10 = vcmask 457728   ;;  %vm1243_vm11 = vcmask 916480   ;;  %vm1437_vm12 = vcmask 326656  }
  0x20   :  { %v2344_v53 = vld [vmem:[%s3398_s6 + $0x40] sm:$0xff]   ;;  %s2405_s6 = smov 96   ;;  %vm2849_vm6 = vmand %vm545_vm4, %vm546_vm5  ;;  %vm1633_vm13 = vcmask 523264  }
  0x22   :  { %2259 = vmatmul.mubr.msk.bf16.gmra.mrb[12].mxu1 %vm95_vm0, %v71_v25  ;;  %2225 = vmatpush3.bf16.msra.mxu0 %v2335_v27 }
  0x23   :  { %969 = vmatprep.subr.bf16.mxu0 %v2403_v28 }
  0x25   :  { %2227 = vmatmul.mubr.msk.bf16.vlgmr.msra.gmra.mrb[0].mxu0 %vm95_vm0, %v65_v9 }
  0x26   :  { %970 = vmatpush1.bf16.msra.mxu0 %v2336_v29  ;;  %2230 = vmatprep.mubr.msk.bf16.mxu0 %vm95_vm0, %v66_v10 }
  0x27   :  { %971 = vmatprep.subr.bf16.mxu0 %v2403_v28 }
  0x2a   :  { %972 = vmatpush1.bf16.msra.mxu0 %v2337_v30 }
  0x2b   :  { %973 = vmatprep.subr.bf16.mxu0 %v2403_v28 }
  0x2d   :  { %2231 = vmatmul.mubr.msk.bf16.gmra.mrb[4].mxu0 %vm95_vm0, %v67_v15 }
  0x2e   :  { %974 = vmatpush1.bf16.msra.mxu0 %v2338_v31  ;;  %2234 = vmatprep.mubr.msk.bf16.mxu0 %vm95_vm0, %v68_v16 }
  0x2f   :  { %975 = vmatprep.subr.bf16.mxu0 %v2403_v28 }
  0x32   :  { %976 = vmatpush1.bf16.msra.mxu0 %v2339_v32 }
  0x33   :  { %977 = vmatprep.subr.bf16.mxu0 %v2403_v28 }
  0x35   :  { %2235 = vmatmul.mubr.msk.bf16.gmra.mrb[8].mxu0 %vm95_vm0, %v69_v21 }
  0x36   :  { %978 = vmatpush1.bf16.msra.mxu0 %v2340_v33  ;;  %2238 = vmatprep.mubr.msk.bf16.mxu0 %vm95_vm0, %v70_v22 }
  0x37   :  { %979 = vmatprep.subr.bf16.mxu0 %v2403_v28 }
  0x3a   :  { %980 = vmatpush1.bf16.msra.mxu0 %v2341_v34 }
  0x3b   :  { %981 = vmatprep.subr.bf16.mxu0 %v2403_v28 }
  0x3d   :  { %2239 = vmatmul.mubr.msk.bf16.gmra.mrb[12].mxu0 %vm95_vm0, %v71_v25 }
  0x3e   :  { %982 = vmatpush1.bf16.msra.mxu0 %v2342_v36 }
  0x3f   :  { %983 = vmatprep.subr.bf16.mxu0 %v2403_v28 }
  0x42   :  { %984 = vmatpush1.bf16.msra.mxu0 %v2343_v45 }
  0x43   :  { %985 = vmatprep.subr.bf16.mxu0 %v2403_v28 }
  0x46   :  { %986 = vmatpush1.bf16.msra.mxu0 %v2344_v53 }
  0xdd   :  { %v2248_v37 = vpop.f32.mrb[0].mxu1 }
  0xde   :  { %v299_v38 = vadd.f32 %v2248_v37, %v2585_v35  ;;  %v290_v39 = vpop.f32.mrb[1].mxu1 }
  0xdf   :  { %v291_v40 = vadd.f32 %v2585_v35, %v290_v39  ;;  %v2249_v41 = vpop.f32.mrb[2].mxu1 }
  0xe0   :  { %v355_v42 = vmax.f32 %v299_v38, 0.0  ;;  %v302_v43 = vadd.f32 %v2249_v41, %v2585_v35  ;;  %v293_v44 = vpop.f32.mrb[3].mxu1 }
  0xe1   :  { %v353_v46 = vmax.f32 %v291_v40, 0.0  ;;  %v294_v47 = vadd.f32 %v2585_v35, %v293_v44 }
  0xe2   :  { %v2599_v48 = vpack.c.bf16 %v355_v42, %v355_v42  ;;  %v356_v49 = vmax.f32 %v302_v43, 0.0 }
  0xe3   :  { %v2601_v50 = vpack.c.bf16 %v353_v46, %v353_v46  ;;  %v354_v51 = vmax.f32 %v294_v47, 0.0 }
  0xe4   :  { %v435_v52 = vshll.u32 %v2599_v48, 16  ;;  %v2613_v57 = vpack.c.bf16 %v356_v49, %v356_v49  ;;  %v432_v11 = vshrl.u32 %v2599_v48, 16 }
  0xe5   :  { %v421_v54 = vshll.u32 %v2601_v50, 16  ;;  %v2609_v55 = vpack.c.bf16 %v354_v51, %v354_v51  ;;  %631 = vrot.lane.b32.xlu0 %v2601_v50, %s2404_s29  ;;  %v2252_v56 = vpop.f32.mrb[4].mxu1  ;;  %v418_v62 = vshrl.u32 %v2601_v50, 16 }
  0xe6   :  { %v306_v58 = vpop.f32.mrb[5].mxu1  ;;  %v315_v0 = vadd.f32 %v2252_v56, %v2585_v35  ;;  %v568_v4 = vrot.slane %v435_v52, 1  ;;  %v442_v9 = vshll.u32 %v2613_v57, 16  ;;  %v439_v33 = vshrl.u32 %v2613_v57, 16 }
  0xe7   :  { %v428_v59 = vshll.u32 %v2609_v55, 16  ;;  %v307_v60 = vadd.f32 %v2585_v35, %v306_v58  ;;  %v2253_v61 = vpop.f32.mrb[6].mxu1  ;;  %v564_v63 = vrot.slane %v421_v54, 1  ;;  %v425_v3 = vshrl.u32 %v2609_v55, 16 }
  0xe8   :  { %v309_v2 = vpop.f32.mrb[7].mxu1  ;;  %v318_v10 = vadd.f32 %v2253_v61, %v2585_v35  ;;  %v359_v16 = vmax.f32 %v315_v0, 0.0  ;;  %v569_v17 = vor.u32 %v568_v4, %v432_v11  ;;  %v570_v21 = vrot.slane %v442_v9, 1 }
  0xe9   :  { %633 = vrot.lane.b32.xlu0 %v2609_v55, %s2404_s29  ;;  %v357_v5 = vmax.f32 %v307_v60, 0.0  ;;  %v565_v6 = vor.u32 %v564_v63, %v418_v62  ;;  %v310_v7 = vadd.f32 %v2585_v35, %v309_v2  ;;  %v566_v8 = vrot.slane %v428_v59, 1 }
  0xea   :  { %v360_v20 = vmax.f32 %v318_v10, 0.0  ;;  %v2659_v30 = vpack.c.bf16 %v359_v16, %v359_v16  ;;  %v617_v31 = vsel %vm2622_vm3, %v569_v17, 0  ;;  %v571_v39 = vor.u32 %v570_v21, %v439_v33 }
  0xeb   :  { %v2639_v12 = vpack.c.bf16 %v357_v5, %v357_v5  ;;  %v615_v13 = vsel %vm2622_vm3, %v565_v6, 0  ;;  %v358_v14 = vmax.f32 %v310_v7, 0.0  ;;  %v567_v15 = vor.u32 %v566_v8, %v425_v3 }
  0xec   :  { %679 = vrot.lane.b32.xlu1 %v615_v13, %s2405_s6  ;;  %v2668_v37 = vpack.c.bf16 %v360_v20, %v360_v20  ;;  %v463_v41 = vshll.u32 %v2659_v30, 16  ;;  %v2680_v45 = vrot.slane %v432_v11, 7  ;;  %v618_v53 = vsel %vm2622_vm3, %v571_v39, 0 }
  0xed   :  { %v449_v18 = vshll.u32 %v2639_v12, 16  ;;  %635 = vrot.lane.b32.xlu0 %v2599_v48, %s2404_s29  ;;  %v2256_v19 = vpop.f32.mrb[8].mxu1  ;;  %v446_v22 = vshrl.u32 %v2639_v12, 16  ;;  %v2652_v24 = vpack.c.bf16 %v358_v14, %v358_v14  ;;  %v616_v25 = vsel %vm2622_vm3, %v567_v15, 0 }
  0xee   :  { %v322_v23 = vpop.f32.mrb[9].mxu1  ;;  %v331_v40 = vadd.f32 %v2256_v19, %v2585_v35  ;;  %v470_v51 = vshll.u32 %v2668_v37, 16  ;;  %v576_v0 = vrot.slane %v463_v41, 1  ;;  %v420_v10 = vrot.slane %v418_v62, 7 }
  0xef   :  { %v572_v26 = vrot.slane %v449_v18, 1  ;;  %v323_v27 = vadd.f32 %v2585_v35, %v322_v23  ;;  %v2257_v29 = vpop.f32.mrb[10].mxu1  ;;  %v456_v38 = vshll.u32 %v2652_v24, 16  ;;  %v453_v63 = vshrl.u32 %v2652_v24, 16 }
  0xf0   :  { %681 = vrot.lane.b32.xlu1 %v616_v25, %s2405_s6  ;;  %v325_v32 = vpop.f32.mrb[11].mxu1  ;;  %v334_v47 = vadd.f32 %v2257_v29, %v2585_v35  ;;  %v363_v56 = vmax.f32 %v331_v40, 0.0  ;;  %v427_v11 = vrot.slane %v425_v3, 7  ;;  %v460_v14 = vshrl.u32 %v2659_v30, 16 }
  0xf1   :  { %683 = vrot.lane.b32.xlu0 %v617_v31, %s2405_s6  ;;  %v361_v34 = vmax.f32 %v323_v27, 0.0  ;;  %v573_v36 = vor.u32 %v572_v26, %v446_v22  ;;  %v326_v42 = vadd.f32 %v2585_v35, %v325_v32  ;;  %v574_v58 = vrot.slane %v456_v38, 1 }
  0xf2   :  { %v364_v13 = vmax.f32 %v334_v47, 0.0  ;;  %v2705_v15 = vpack.c.bf16 %v363_v56, %v363_v56  ;;  %v578_v17 = vrot.slane %v470_v51, 1  ;;  %v577_v20 = vor.u32 %v576_v0, %v460_v14 }
  0xf3   :  { %v2678_v43 = vpack.c.bf16 %v361_v34, %v361_v34  ;;  %v619_v46 = vsel %vm2622_vm3, %v573_v36, 0  ;;  %v362_v61 = vmax.f32 %v326_v42, 0.0  ;;  %v575_v16 = vor.u32 %v574_v58, %v453_v63 }
  0xf4   :  { %637 = vrot.lane.b32.xlu1 %v2613_v57, %s2404_s29  ;;  %v467_v3 = vshrl.u32 %v2668_v37, 16  ;;  %v441_v27 = vrot.slane %v439_v33, 7  ;;  %v448_v29 = vrot.slane %v446_v22, 7  ;;  %v2721_v31 = vpack.c.bf16 %v364_v13, %v364_v13 }
  0xf5   :  { %639 = vrot.lane.b32.xlu0 %v2639_v12, %s2404_s29  ;;  %v2260_v44 = vpop.f32.mrb[12].mxu1  ;;  %v477_v5 = vshll.u32 %v2678_v43, 16  ;;  %v474_v23 = vshrl.u32 %v2678_v43, 16  ;;  %v455_v32 = vrot.slane %v453_v63, 7  ;;  %v491_v34 = vshll.u32 %v2705_v15, 16 }
  0xf6   :  { %v338_v49 = vpop.f32.mrb[13].mxu1  ;;  %v347_v2 = vadd.f32 %v2260_v44, %v2585_v35  ;;  %v620_v36 = vsel %vm2622_vm3, %v575_v16, 0  ;;  %v579_v39 = vor.u32 %v578_v17, %v467_v3  ;;  %v621_v33 = vsel %vm2622_vm3, %v577_v20, 0 }
  0xf7   :  { %v2261_v60 = vpop.f32.mrb[14].mxu1  ;;  %v339_v6 = vadd.f32 %v2585_v35, %v338_v49  ;;  %v580_v25 = vrot.slane %v477_v5, 1  ;;  %v498_v56 = vshll.u32 %v2721_v31, 16  ;;  %v469_v58 = vrot.slane %v467_v3, 7 }
  0xf8   :  { %685 = vrot.lane.b32.xlu1 %v618_v53, %s2405_s6  ;;  %v341_v4 = vpop.f32.mrb[15].mxu1  ;;  %v350_v7 = vadd.f32 %v2261_v60, %v2585_v35  ;;  %v367_v62 = vmax.f32 %v347_v2, 0.0  ;;  %v488_v60 = vshrl.u32 %v2705_v15, 16  ;;  %v622_v63 = vsel %vm2622_vm3, %v579_v39, 0 }
  0xf9   :  { %687 = vrot.lane.b32.xlu0 %v619_v46, %s2405_s6  ;;  %v342_v8 = vadd.f32 %v2585_v35, %v341_v4  ;;  %v2711_v35 = vpack.c.bf16 %v362_v61, %v362_v61  ;;  %v365_v26 = vmax.f32 %v339_v6, 0.0  ;;  %v462_v46 = vrot.slane %v460_v14, 7 }
  0xfa   :  { %v368_v21 = vmax.f32 %v350_v7, 0.0  ;;  %v2732_v44 = vpack.c.bf16 %v367_v62, %v367_v62  ;;  %v581_v47 = vor.u32 %v580_v25, %v474_v23  ;;  %v495_v61 = vshrl.u32 %v2721_v31, 16 }
  0xfb   :  { %v366_v19 = vmax.f32 %v342_v8, 0.0  ;;  %v484_v42 = vshll.u32 %v2711_v35, 16  ;;  %v2159_v49 = vpack.c.bf16 %v365_v26, %v365_v26  ;;  %v481_v53 = vshrl.u32 %v2711_v35, 16 }
  0xfc   :  { %641 = vrot.lane.b32.xlu1 %v2652_v24, %s2404_s29  ;;  %v2734_v22 = vpack.c.bf16 %v368_v21, %v368_v21  ;;  %v476_v0 = vrot.slane %v474_v23, 7  ;;  %v516_v7 = vshrl.u32 %v2732_v44, 16  ;;  %v2750_v13 = vor.u32 %v421_v54, %v420_v10 }
  0xfd   :  { %643 = vrot.lane.b32.xlu0 %v2659_v30, %s2404_s29  ;;  %v2726_v40 = vpack.c.bf16 %v366_v19, %v366_v19  ;;  %v502_v2 = vshrl.u32 %v2159_v49, 16  ;;  %v582_v6 = vrot.slane %v484_v42, 1  ;;  %v623_v14 = vsel %vm2622_vm3, %v581_v47, 0 }
  0xfe   :  { %v523_v8 = vshrl.u32 %v2734_v22, 16  ;;  %v483_v16 = vrot.slane %v481_v53, 7  ;;  %v2758_v17 = vor.u32 %v428_v59, %v427_v11  ;;  %v2763_v19 = vor.u32 %v435_v52, %v2680_v45 }
  0xff   :  { %v509_v4 = vshrl.u32 %v2726_v40, 16  ;;  %v490_v20 = vrot.slane %v488_v60, 7  ;;  %v584_v50 = vrot.slane %v491_v34, 1  ;;  %v497_v54 = vrot.slane %v495_v61, 7 }
 0x100   :  { %689 = vrot.lane.b32.xlu1 %v620_v36, %s2405_s6  ;;  %v2767_v10 = vor.u32 %v442_v9, %v441_v27  ;;  %v504_v62 = vrot.slane %v502_v2, 7  ;;  %v2771_v3 = vor.u32 %v449_v18, %v448_v29  ;;  %v2775_v55 = vor.u32 %v456_v38, %v455_v32 }
 0x101   :  { %691 = vrot.lane.b32.xlu0 %v621_v33, %s2405_s6  ;;  %v511_v21 = vrot.slane %v509_v4, 7  ;;  %v518_v48 = vrot.slane %v516_v7, 7  ;;  %v525_v52 = vrot.slane %v523_v8, 7  ;;  %v2782_v57 = vor.u32 %v463_v41, %v462_v46 }
 0x102   :  { %v2786_v59 = vor.u32 %v470_v51, %v469_v58  ;;  %v505_v9 = vshll.u32 %v2159_v49, 16  ;;  %v512_v12 = vshll.u32 %v2726_v40, 16  ;;  %v2792_v18 = vor.u32 %v477_v5, %v476_v0 }
 0x103   :  { %v2794_v24 = vor.u32 %v484_v42, %v483_v16  ;;  %v519_v38 = vshll.u32 %v2732_v44, 16  ;;  %v526_v30 = vshll.u32 %v2734_v22, 16  ;;  %v2798_v41 = vor.u32 %v491_v34, %v490_v20  ;;  %v2347_v20 = vld [vmem:[%s3402_s10 + $0x10] sm:$0xff]  }
 0x104   :  { %645 = vrot.lane.b32.xlu1 %v2668_v37, %s2404_s29  ;;  %v2800_v37 = vor.u32 %v498_v56, %v497_v54  ;;  %v583_v45 = vor.u32 %v582_v6, %v481_v53  ;;  %v2802_v51 = vor.u32 %v505_v9, %v504_v62  ;;  %v2804_v11 = vor.u32 %v512_v12, %v511_v21 }
 0x105   :  { %647 = vrot.lane.b32.xlu0 %v2678_v43, %s2404_s29  ;;  %v585_v43 = vor.u32 %v584_v50, %v488_v60  ;;  %v2808_v5 = vor.u32 %v519_v38, %v518_v48  ;;  %v2810_v23 = vor.u32 %v526_v30, %v525_v52  ;;  %v588_v25 = vrot.slane %v505_v9, 1 }
 0x106   :  { %v624_v26 = vsel %vm2622_vm3, %v583_v45, 0  ;;  %v586_v27 = vrot.slane %v498_v56, 1  ;;  %v590_v36 = vrot.slane %v512_v12, 1  ;;  %v592_v39 = vrot.slane %v519_v38, 1 }
 0x107   :  { %v625_v29 = vsel %vm2622_vm3, %v585_v43, 0  ;;  %v594_v47 = vrot.slane %v526_v30, 1  ;;  %v549_v1 = vsel %vm2849_vm6, 0, %v2758_v17  ;;  %v550_v50 = vsel %vm2849_vm6, 0, %v2763_v19 }
 0x108   :  { %693 = vrot.lane.b32.xlu1 %v622_v63, %s2405_s6  ;;  %v587_v32 = vor.u32 %v586_v27, %v495_v61  ;;  %v591_v42 = vor.u32 %v590_v36, %v509_v4  ;;  %v593_v33 = vor.u32 %v592_v39, %v516_v7  ;;  %v551_v54 = vsel %vm2849_vm6, 0, %v2767_v10 }
 0x109   :  { %695 = vrot.lane.b32.xlu0 %v623_v14, %s2405_s6  ;;  %v552_v10 = vsel %vm2849_vm6, 0, %v2771_v3  ;;  %v553_v43 = vsel %vm2849_vm6, 0, %v2775_v55  ;;  %v554_v55 = vsel %vm2849_vm6, 0, %v2782_v57  ;;  %v555_v39 = vsel %vm2849_vm6, 0, %v2786_v59 }
 0x10a   :  { %v626_v34 = vsel %vm2622_vm3, %v587_v32, 0  ;;  %v628_v46 = vsel %vm2622_vm3, %v591_v42, 0  ;;  %v556_v59 = vsel %vm2849_vm6, 0, %v2792_v18 }
 0x10c   :  { %649 = vrot.lane.b32.xlu1 %v2711_v35, %s2404_s29  ;;  %v589_v35 = vor.u32 %v588_v25, %v502_v2 }
 0x10d   :  { %651 = vrot.lane.b32.xlu0 %v2705_v15, %s2404_s29 }
 0x10e   :  { %v627_v15 = vsel %vm2622_vm3, %v589_v35, 0 }
 0x110   :  { %697 = vrot.lane.b32.xlu1 %v624_v26, %s2405_s6 }
 0x111   :  { %699 = vrot.lane.b32.xlu0 %v625_v29, %s2405_s6 }
 0x114   :  { %653 = vrot.lane.b32.xlu1 %v2721_v31, %s2404_s29  ;;  %v2345_v31 = vld [vmem:[%s3402_s10] sm:$0xff]  }
 0x115   :  { %655 = vrot.lane.b32.xlu0 %v2159_v49, %s2404_s29  ;;  %v629_v49 = vsel %vm2622_vm3, %v593_v33, 0  ;;  %2286 = vmatprep.subr.bf16.mxu0 %v2345_v31 }
 0x118   :  { %701 = vrot.lane.b32.xlu1 %v626_v34, %s2405_s6 }
 0x119   :  { %703 = vrot.lane.b32.xlu0 %v627_v15, %s2405_s6 }
 0x11c   :  { %657 = vrot.lane.b32.xlu1 %v2726_v40, %s2404_s29  ;;  %v595_v40 = vor.u32 %v594_v47, %v523_v8 }
 0x11d   :  { %659 = vrot.lane.b32.xlu0 %v2732_v44, %s2404_s29 }
 0x11e   :  { %v630_v44 = vsel %vm2622_vm3, %v595_v40, 0 }
 0x120   :  { %705 = vrot.lane.b32.xlu1 %v628_v46, %s2405_s6 }
 0x121   :  { %707 = vrot.lane.b32.xlu0 %v629_v49, %s2405_s6 }
 0x124   :  { %661 = vrot.lane.b32.xlu1 %v2734_v22, %s2404_s29  ;;  %v548_v22 = vsel %vm2849_vm6, 0, %v2750_v13  ;;  %v2346_v13 = vld [vmem:[%s3402_s10 + $0x8] sm:$0xff]  }
 0x128   :  { %709 = vrot.lane.b32.xlu1 %v630_v44, %s2405_s6 }
 0x157   :  { %v632_v53 = vpop.permute.xlu0 %631 }
 0x158   :  { %v714_v63 = vsel %vm711_vm7, %v548_v22, %v632_v53 }
 0x15b   :  { %v634_v56 = vpop.permute.xlu0 %633 }
 0x15c   :  { %v717_v0 = vsel %vm711_vm7, %v549_v1, %v634_v56  ;;  %v557_v56 = vsel %vm2849_vm6, 0, %v2794_v24  ;;  %v2228_v24 = vpop.f32.mrb[0].mxu0 }
 0x15e   :  { %v680_v60 = vpop.permute.xlu1 %679 }
 0x15f   :  { %v636_v61 = vpop.permute.xlu0 %635  ;;  %v762_v4 = vsel %vm760_vm8, %v714_v63, %v680_v60 }
 0x160   :  { %v720_v62 = vsel %vm711_vm7, %v550_v50, %v636_v61 }
 0x162   :  { %v682_v2 = vpop.permute.xlu1 %681 }
 0x163   :  { %v764_v6 = vsel %vm760_vm8, %v717_v0, %v682_v2  ;;  %v2038_v7 = vcombine.low %v680_v60, %v682_v2  ;;  %v684_v8 = vpop.permute.xlu0 %683 }
 0x164   :  { %v2037_v14 = vcombine.low %v762_v4, %v764_v6  ;;  %v766_v52 = vsel %vm760_vm8, %v720_v62, %v684_v8  ;;  %v2916_v4 = vld [vmem:[%s3395_s3] ss:$0 sm:$0xff]  ;;  %v559_v62 = vsel %vm2849_vm6, 0, %v2800_v37 }
 0x165   :  { %2062 = vmatprep.mubr.msk.bf16.mxu0 %vm944_vm9, %v2038_v7  ;;  %v163_v7 = vadd.f32 %v2228_v24, %v2916_v4 }
 0x166   :  { %v638_v16 = vpop.permute.xlu1 %637  ;;  %1002 = vmatmul.mubr.bf16.vlgmr.msra.gmra.mrb[16].mxu0 %v2037_v14 }
 0x167   :  { %v640_v17 = vpop.permute.xlu0 %639  ;;  %2287 = vmatpush3.bf16.msra.mxu0 %v2345_v31  ;;  %v723_v21 = vsel %vm711_vm7, %v551_v54, %v638_v16  ;;  %v558_v54 = vsel %vm2849_vm6, 0, %v2798_v41 }
 0x168   :  { %2288 = vmatprep.subr.bf16.mxu0 %v2346_v13  ;;  %v726_v25 = vsel %vm711_vm7, %v552_v10, %v640_v17  ;;  %v219_v17 = vmax.f32 %v163_v7, 0.0  ;;  %v562_v7 = vsel %vm2849_vm6, 0, %v2808_v5 }
 0x16a   :  { %v686_v48 = vpop.permute.xlu1 %685 }
 0x16b   :  { %v768_v9 = vsel %vm760_vm8, %v723_v21, %v686_v48  ;;  %v2040_v12 = vcombine.low %v684_v8, %v686_v48  ;;  %v688_v38 = vpop.permute.xlu0 %687  ;;  %2289 = vmatpush3.bf16.msra.mxu0 %v2346_v13  ;;  %v154_v8 = vpop.f32.mrb[1].mxu0 }
 0x16c   :  { %v2039_v30 = vcombine.low %v766_v52, %v768_v9  ;;  %2290 = vmatprep.subr.bf16.mxu0 %v2347_v20  ;;  %v770_v29 = vsel %vm760_vm8, %v726_v25, %v688_v38  ;;  %v155_v13 = vadd.f32 %v2916_v4, %v154_v8  ;;  %v2229_v16 = vpop.f32.mrb[2].mxu0  ;;  %v563_v8 = vsel %vm2849_vm6, 0, %v2810_v23 }
 0x16d   :  { %2063 = vmatprep.mubr.msk.bf16.mxu0 %vm944_vm9, %v2040_v12  ;;  %v157_v50 = vpop.f32.mrb[3].mxu0 }
 0x16e   :  { %v642_v19 = vpop.permute.xlu1 %641  ;;  %1010 = vmatmul.mubr.bf16.gmra.mrb[20].mxu0 %v2039_v30  ;;  %v217_v21 = vmax.f32 %v155_v13, 0.0  ;;  %v158_v48 = vadd.f32 %v2916_v4, %v157_v50 }
 0x16f   :  { %v644_v45 = vpop.permute.xlu0 %643  ;;  %2291 = vmatpush3.bf16.msra.mxu0 %v2347_v20  ;;  %v729_v26 = vsel %vm711_vm7, %v553_v43, %v642_v19  ;;  %v166_v20 = vadd.f32 %v2229_v16, %v2916_v4 }
 0x170   :  { %v732_v42 = vsel %vm711_vm7, %v554_v55, %v644_v45  ;;  %v218_v10 = vmax.f32 %v158_v48, 0.0  ;;  %v560_v55 = vsel %vm2849_vm6, 0, %v2802_v51 }
 0x172   :  { %v690_v27 = vpop.permute.xlu1 %689  ;;  %v1579_v37 = vpack.c.bf16 %v218_v10, %v217_v21 }
 0x173   :  { %v772_v35 = vsel %vm760_vm8, %v729_v26, %v690_v27  ;;  %v2042_v32 = vcombine.low %v688_v38, %v690_v27  ;;  %v692_v15 = vpop.permute.xlu0 %691  ;;  %v220_v38 = vmax.f32 %v166_v20, 0.0  ;;  %v2232_v26 = vpop.f32.mrb[4].mxu0 }
 0x174   :  { %v2041_v34 = vcombine.low %v770_v29, %v772_v35  ;;  %v774_v46 = vsel %vm760_vm8, %v732_v42, %v692_v15  ;;  %v179_v29 = vadd.f32 %v2232_v26, %v2916_v4  ;;  %v170_v35 = vpop.f32.mrb[5].mxu0 }
 0x175   :  { %2064 = vmatprep.mubr.msk.bf16.mxu0 %vm944_vm9, %v2042_v32  ;;  %v2933_v25 = vpack.c.bf16 %v220_v38, %v219_v17  ;;  %v171_v32 = vadd.f32 %v2916_v4, %v170_v35 }
 0x176   :  { %v646_v36 = vpop.permute.xlu1 %645  ;;  %1018 = vmatmul.mubr.bf16.gmra.mrb[24].mxu0 %v2041_v34  ;;  %v223_v34 = vmax.f32 %v179_v29, 0.0 }
 0x177   :  { %v648_v3 = vpop.permute.xlu0 %647  ;;  %v735_v33 = vsel %vm711_vm7, %v555_v39, %v646_v36  ;;  %v561_v39 = vsel %vm2849_vm6, 0, %v2804_v11  ;;  %v221_v42 = vmax.f32 %v171_v32, 0.0  ;;  %v2351_v32 = vld [vmem:[%s3400_s8 + $0x18] sm:$0xff]  }
 0x178   :  { %v738_v60 = vsel %vm711_vm7, %v556_v59, %v648_v3 }
 0x17a   :  { %v694_v31 = vpop.permute.xlu1 %693 }
 0x17b   :  { %v776_v47 = vsel %vm760_vm8, %v735_v33, %v694_v31  ;;  %v2044_v49 = vcombine.low %v692_v15, %v694_v31  ;;  %v696_v40 = vpop.permute.xlu0 %695  ;;  %v2233_v15 = vpop.f32.mrb[6].mxu0 }
 0x17c   :  { %v2043_v44 = vcombine.low %v774_v46, %v776_v47  ;;  %v778_v1 = vsel %vm760_vm8, %v738_v60, %v696_v40  ;;  %v182_v36 = vadd.f32 %v2233_v15, %v2916_v4  ;;  %v173_v3 = vpop.f32.mrb[7].mxu0  ;;  %v2352_v15 = vld [vmem:[%s3400_s8 + $0x20] sm:$0xff]  }
 0x17d   :  { %2065 = vmatprep.mubr.msk.bf16.mxu0 %vm944_vm9, %v2044_v49  ;;  %v174_v33 = vadd.f32 %v2916_v4, %v173_v3  ;;  %v2236_v60 = vpop.f32.mrb[8].mxu0  ;;  %v2355_v3 = vld [vmem:[%s3400_s8 + $0x38] sm:$0xff]  }
 0x17e   :  { %v650_v53 = vpop.permute.xlu1 %649  ;;  %1026 = vmatmul.mubr.bf16.gmra.mrb[28].mxu0 %v2043_v44 }
 0x17f   :  { %v652_v57 = vpop.permute.xlu0 %651  ;;  %v741_v61 = vsel %vm711_vm7, %v557_v56, %v650_v53  ;;  %v222_v51 = vmax.f32 %v174_v33, 0.0 }
 0x180   :  { %v744_v52 = vsel %vm711_vm7, %v558_v54, %v652_v57 }
 0x181   :  { %v1581_v11 = vpack.c.bf16 %v222_v51, %v221_v42  ;;  %v2357_v42 = vld [vmem:[%s3400_s8 + $0x48] sm:$0xff]  }
 0x182   :  { %v698_v22 = vpop.permute.xlu1 %697 }
 0x183   :  { %v780_v63 = vsel %vm760_vm8, %v741_v61, %v698_v22  ;;  %v2046_v0 = vcombine.low %v696_v40, %v698_v22  ;;  %v700_v2 = vpop.permute.xlu0 %699  ;;  %v224_v40 = vmax.f32 %v182_v36, 0.0  ;;  %v195_v22 = vadd.f32 %v2236_v60, %v2916_v4  ;;  %v2354_v36 = vld [vmem:[%s3400_s8 + $0x30] sm:$0xff]  }
 0x184   :  { %v2045_v18 = vcombine.low %v778_v1, %v780_v63  ;;  %v782_v30 = vsel %vm760_vm8, %v744_v52, %v700_v2  ;;  %v186_v1 = vpop.f32.mrb[9].mxu0 }
 0x185   :  { %2066 = vmatprep.mubr.msk.bf16.mxu0 %vm944_vm9, %v2046_v0  ;;  %v1582_v56 = vpack.c.bf16 %v224_v40, %v223_v34  ;;  %v187_v63 = vadd.f32 %v2916_v4, %v186_v1  ;;  %v2237_v0 = vpop.f32.mrb[10].mxu0  ;;  %v2353_v34 = vld [vmem:[%s3400_s8 + $0x28] sm:$0xff]  }
 0x186   :  { %v654_v6 = vpop.permute.xlu1 %653  ;;  %1034 = vmatmul.mubr.bf16.gmra.mrb[32].mxu0 %v2045_v18  ;;  %v227_v18 = vmax.f32 %v195_v22, 0.0  ;;  %v198_v24 = vadd.f32 %v2237_v0, %v2916_v4 }
 0x187   :  { %v656_v14 = vpop.permute.xlu0 %655  ;;  %v747_v9 = vsel %vm711_vm7, %v559_v62, %v654_v6  ;;  %v189_v6 = vpop.f32.mrb[11].mxu0 }
 0x188   :  { %v750_v31 = vsel %vm711_vm7, %v560_v55, %v656_v14  ;;  %v225_v14 = vmax.f32 %v187_v63, 0.0  ;;  %v190_v13 = vadd.f32 %v2916_v4, %v189_v6  ;;  %v228_v50 = vmax.f32 %v198_v24, 0.0  ;;  %v2240_v58 = vpop.f32.mrb[12].mxu0  ;;  %v2356_v55 = vld [vmem:[%s3400_s8 + $0x40] sm:$0xff]  }
 0x18a   :  { %v702_v12 = vpop.permute.xlu1 %701  ;;  %v226_v48 = vmax.f32 %v190_v13, 0.0  ;;  %v1584_v52 = vpack.c.bf16 %v228_v50, %v227_v18 }
 0x18b   :  { %v784_v19 = vsel %vm760_vm8, %v747_v9, %v702_v12  ;;  %v2048_v45 = vcombine.low %v700_v2, %v702_v12  ;;  %v704_v43 = vpop.permute.xlu0 %703  ;;  %v211_v9 = vadd.f32 %v2240_v58, %v2916_v4  ;;  %v202_v12 = vpop.f32.mrb[13].mxu0 }
 0x18c   :  { %v2047_v41 = vcombine.low %v782_v30, %v784_v19  ;;  %v786_v44 = vsel %vm760_vm8, %v750_v31, %v704_v43  ;;  %v1583_v23 = vpack.c.bf16 %v226_v48, %v225_v14  ;;  %v203_v38 = vadd.f32 %v2916_v4, %v202_v12  ;;  %v2241_v30 = vpop.f32.mrb[14].mxu0 }
 0x18d   :  { %2067 = vmatprep.mubr.msk.bf16.mxu0 %vm944_vm9, %v2048_v45  ;;  %v231_v19 = vmax.f32 %v211_v9, 0.0  ;;  %v214_v45 = vadd.f32 %v2241_v30, %v2916_v4  ;;  %v205_v10 = vpop.f32.mrb[15].mxu0 }
 0x18e   :  { %v658_v27 = vpop.permute.xlu1 %657  ;;  %1042 = vmatmul.mubr.bf16.gmra.mrb[36].mxu0 %v2047_v41  ;;  %v229_v41 = vmax.f32 %v203_v38, 0.0 }
 0x18f   :  { %v753_v46 = vsel %vm711_vm7, %v561_v39, %v658_v27  ;;  %v660_v47 = vpop.permute.xlu0 %659  ;;  %v232_v26 = vmax.f32 %v214_v45, 0.0  ;;  %v3018_v39 = vld [vmem:[%s3399_s7] ss:$0 sm:$0xff]  ;;  %s2406_s7 = smov 56  }
 0x190   :  { %v756_v16 = vsel %vm711_vm7, %v562_v7, %v660_v47 }
 0x191   :  { %v1586_v29 = vpack.c.bf16 %v232_v26, %v231_v19 }
 0x192   :  { %v706_v49 = vpop.permute.xlu1 %705 }
 0x193   :  { %v788_v53 = vsel %vm760_vm8, %v753_v46, %v706_v49  ;;  %v2050_v57 = vcombine.low %v704_v43, %v706_v49  ;;  %v708_v2 = vpop.permute.xlu0 %707  ;;  %v206_v43 = vadd.f32 %v2916_v4, %v205_v10  ;;  %v2348_v4 = vld [vmem:[%s3400_s8] sm:$0xff]  }
 0x194   :  { %v2049_v59 = vcombine.low %v786_v44, %v788_v53  ;;  %v790_v54 = vsel %vm760_vm8, %v756_v16, %v708_v2  ;;  %1467 = vmatpush1.bf16.msra.mxu1 %v2348_v4  ;;  %v2358_v53 = vld [vmem:[%s3400_s8 + $0x50] ss:$0 sps:$4 sm:$0xff]  }
 0x195   :  { %2068 = vmatprep.mubr.msk.bf16.mxu0 %vm944_vm9, %v2050_v57  ;;  %v230_v27 = vmax.f32 %v206_v43, 0.0  ;;  %1468 = vmatprep.subr.bf16.mxu1 %v2403_v28 }
 0x196   :  { %v662_v61 = vpop.permute.xlu1 %661  ;;  %1050 = vmatmul.mubr.bf16.gmra.mrb[40].mxu0 %v2049_v59  ;;  %v1464_v59 = vsel %vm612_vm1, %v2358_v53, 0 }
 0x197   :  { %v759_v17 = vsel %vm711_vm7, %v563_v8, %v662_v61  ;;  %v1585_v35 = vpack.c.bf16 %v230_v27, %v229_v41  ;;  %v2086_v27 = vcombine.low %v2403_v28, %v2403_v28 }
 0x19a   :  { %v710_v20 = vpop.permute.xlu1 %709 }
 0x19b   :  { %v792_v62 = vsel %vm760_vm8, %v759_v17, %v710_v20  ;;  %v2052_v21 = vcombine.low %v708_v2, %v710_v20 }
 0x19c   :  { %v2051_v5 = vcombine.low %v790_v54, %v792_v62 }
 0x19d   :  { %2069 = vmatprep.mubr.msk.bf16.mxu0 %vm944_vm9, %v2052_v21 }
 0x19e   :  { %1058 = vmatmul.mubr.bf16.gmra.mrb[44].mxu0 %v2051_v5 }
 0x19f   :  { %2292 = vmatprep.mubr.msk.bf16.mxu0 %vm711_vm7, %v1579_v37  ;;  %v2350_v37 = vld [vmem:[%s3400_s8 + $0x10] sm:$0xff]  }
 0x1a6   :  { %2293 = vmatmul.mubr.msk.bf16.vlgmr.msra.gmra.mrb[48].mxu0 %vm711_vm7, %v2933_v25  ;;  %v2349_v25 = vld [vmem:[%s3400_s8 + $0x8] sm:$0xff]   ;;  %s2407_s8 = smov 112  }
 0x1a7   :  { %2296 = vmatprep.mubr.msk.bf16.mxu0 %vm711_vm7, %v1581_v11  ;;  %1469 = vmatpush1.bf16.msra.mxu1 %v2349_v25 }
 0x1a8   :  { %1470 = vmatprep.subr.bf16.mxu1 %v2403_v28 }
 0x1ab   :  { %1471 = vmatpush1.bf16.msra.mxu1 %v2350_v37 }
 0x1ac   :  { %1472 = vmatprep.subr.bf16.mxu1 %v2403_v28 }
 0x1ae   :  { %2297 = vmatmul.mubr.msk.bf16.gmra.mrb[52].mxu0 %vm711_vm7, %v1582_v56 }
 0x1af   :  { %2300 = vmatprep.mubr.msk.bf16.mxu0 %vm711_vm7, %v1583_v23  ;;  %1473 = vmatpush1.bf16.msra.mxu1 %v2351_v32 }
 0x1b0   :  { %1474 = vmatprep.subr.bf16.mxu1 %v2403_v28 }
 0x1b3   :  { %1475 = vmatpush1.bf16.msra.mxu1 %v2352_v15 }
 0x1b4   :  { %1476 = vmatprep.subr.bf16.mxu1 %v2403_v28 }
 0x1b6   :  { %2301 = vmatmul.mubr.msk.bf16.gmra.mrb[56].mxu0 %vm711_vm7, %v1584_v52 }
 0x1b7   :  { %2304 = vmatprep.mubr.msk.bf16.mxu0 %vm711_vm7, %v1585_v35  ;;  %1477 = vmatpush1.bf16.msra.mxu1 %v2353_v34 }
 0x1b8   :  { %1478 = vmatprep.subr.bf16.mxu1 %v2403_v28 }
 0x1bb   :  { %1479 = vmatpush1.bf16.msra.mxu1 %v2354_v36 }
 0x1bc   :  { %1480 = vmatprep.subr.bf16.mxu1 %v2403_v28 }
 0x1be   :  { %2305 = vmatmul.mubr.msk.bf16.gmra.mrb[60].mxu0 %vm711_vm7, %v1586_v29 }
 0x1bf   :  { %1481 = vmatpush1.bf16.msra.mxu1 %v2355_v3 }
 0x1c0   :  { %1482 = vmatprep.subr.bf16.mxu1 %v2403_v28 }
 0x1c3   :  { %1483 = vmatpush1.bf16.msra.mxu1 %v2356_v55 }
 0x1c4   :  { %1484 = vmatprep.subr.bf16.mxu1 %v2403_v28 }
 0x1c7   :  { %1485 = vmatpush1.bf16.msra.mxu1 %v2357_v42 }
 0x1c8   :  { %1486 = vmatprep.subr.bf16.mxu1 %v2403_v28 }
 0x1cb   :  { %1487 = vmatpush1.bf16.msra.mxu1 %v1464_v59 }
 0x239   :  { %v1003_v33 = vpop.f32.mrb[16].mxu0 }
 0x23a   :  { %v1004_v31 = vadd.f32 %v3018_v39, %v1003_v33  ;;  %v1005_v46 = vpop.f32.mrb[17].mxu0 }
 0x23b   :  { %v1006_v47 = vpop.f32.mrb[18].mxu0 }
 0x23c   :  { %v1066_v49 = vmax.f32 %v1004_v31, 0.0  ;;  %v1007_v40 = vadd.f32 %v3018_v39, %v1006_v47  ;;  %v1008_v44 = vpop.f32.mrb[19].mxu0 }
 0x23e   :  { %v3029_v57 = vpack.c.bf16 %v1066_v49, %v1066_v49  ;;  %v1067_v51 = vmax.f32 %v1007_v40, 0.0 }
 0x240   :  { %v3032_v56 = vpack.c.bf16 %v1067_v51, %v1067_v51  ;;  %1130 = vrot.lane.b32.xlu0 %v3029_v57, %s2406_s7 }
 0x241   :  { %v1011_v11 = vpop.f32.mrb[20].mxu0 }
 0x242   :  { %v1012_v60 = vadd.f32 %v3018_v39, %v1011_v11  ;;  %v1013_v61 = vpop.f32.mrb[21].mxu0  ;;  %1132 = vrot.lane.b32.xlu1 %v3032_v56, %s2406_s7 }
 0x243   :  { %v1014_v22 = vpop.f32.mrb[22].mxu0 }
 0x244   :  { %v1068_v1 = vmax.f32 %v1012_v60, 0.0  ;;  %v1015_v63 = vadd.f32 %v3018_v39, %v1014_v22  ;;  %v1016_v0 = vpop.f32.mrb[23].mxu0  ;;  %1165 = vrot.lane.b32.xlu0 %v3032_v56, %s2407_s8 }
 0x246   :  { %v3042_v2 = vpack.c.bf16 %v1068_v1, %v1068_v1  ;;  %v1069_v18 = vmax.f32 %v1015_v63, 0.0 }
 0x248   :  { %1167 = vrot.lane.b32.xlu1 %v3042_v2, %s2407_s8  ;;  %1134 = vrot.lane.b32.xlu0 %v3042_v2, %s2406_s7  ;;  %v3048_v6 = vpack.c.bf16 %v1069_v18, %v1069_v18 }
 0x249   :  { %v1019_v24 = vpop.f32.mrb[24].mxu0 }
 0x24a   :  { %v1020_v7 = vadd.f32 %v3018_v39, %v1019_v24  ;;  %v1021_v8 = vpop.f32.mrb[25].mxu0 }
 0x24b   :  { %v1022_v14 = vpop.f32.mrb[26].mxu0 }
 0x24c   :  { %v1070_v13 = vmax.f32 %v1020_v7, 0.0  ;;  %v1023_v16 = vadd.f32 %v3018_v39, %v1022_v14  ;;  %v1024_v17 = vpop.f32.mrb[27].mxu0  ;;  %1136 = vrot.lane.b32.xlu1 %v3048_v6, %s2406_s7  ;;  %1169 = vrot.lane.b32.xlu0 %v3048_v6, %s2407_s8  ;;  %v2359_v7 = vld [vmem:[%s3403_s11] sm:$0xff]  }
 0x24d   :  { %2262 = vmatprep.subr.bf16.mxu1 %v2359_v7 }
 0x24e   :  { %v3056_v20 = vpack.c.bf16 %v1070_v13, %v1070_v13  ;;  %v1071_v50 = vmax.f32 %v1023_v16, 0.0 }
 0x250   :  { %1171 = vrot.lane.b32.xlu1 %v3056_v20, %s2407_s8  ;;  %1138 = vrot.lane.b32.xlu0 %v3056_v20, %s2406_s7  ;;  %v3062_v62 = vpack.c.bf16 %v1071_v50, %v1071_v50 }
 0x251   :  { %v1027_v54 = vpop.f32.mrb[28].mxu0 }
 0x252   :  { %v1028_v21 = vadd.f32 %v3018_v39, %v1027_v54  ;;  %v1029_v48 = vpop.f32.mrb[29].mxu0 }
 0x253   :  { %v1030_v5 = vpop.f32.mrb[30].mxu0 }
 0x254   :  { %v1072_v52 = vmax.f32 %v1028_v21, 0.0  ;;  %v1031_v23 = vadd.f32 %v3018_v39, %v1030_v5  ;;  %v1032_v58 = vpop.f32.mrb[31].mxu0  ;;  %1140 = vrot.lane.b32.xlu1 %v3062_v62, %s2406_s7  ;;  %1173 = vrot.lane.b32.xlu0 %v3062_v62, %s2407_s8 }
 0x256   :  { %v3070_v9 = vpack.c.bf16 %v1072_v52, %v1072_v52  ;;  %v1073_v12 = vmax.f32 %v1031_v23, 0.0 }
 0x258   :  { %1175 = vrot.lane.b32.xlu1 %v3070_v9, %s2407_s8  ;;  %1142 = vrot.lane.b32.xlu0 %v3070_v9, %s2406_s7  ;;  %v2177_v30 = vpack.c.bf16 %v1073_v12, %v1073_v12 }
 0x259   :  { %v1035_v38 = vpop.f32.mrb[32].mxu0 }
 0x25a   :  { %v1036_v19 = vadd.f32 %v3018_v39, %v1035_v38  ;;  %v1037_v45 = vpop.f32.mrb[33].mxu0 }
 0x25b   :  { %v1038_v10 = vpop.f32.mrb[34].mxu0 }
 0x25c   :  { %v1074_v41 = vmax.f32 %v1036_v19, 0.0  ;;  %v1039_v43 = vadd.f32 %v3018_v39, %v1038_v10  ;;  %v1040_v26 = vpop.f32.mrb[35].mxu0  ;;  %1144 = vrot.lane.b32.xlu1 %v2177_v30, %s2406_s7  ;;  %1177 = vrot.lane.b32.xlu0 %v2177_v30, %s2407_s8 }
 0x25e   :  { %v3082_v29 = vpack.c.bf16 %v1074_v41, %v1074_v41  ;;  %v1075_v35 = vmax.f32 %v1039_v43, 0.0 }
 0x260   :  { %1179 = vrot.lane.b32.xlu1 %v2086_v27, %s2407_s8  ;;  %1146 = vrot.lane.b32.xlu0 %v3082_v29, %s2406_s7  ;;  %v3087_v25 = vpack.c.bf16 %v1075_v35, %v1075_v35 }
 0x261   :  { %v1043_v4 = vpop.f32.mrb[36].mxu0 }
 0x262   :  { %v1044_v37 = vadd.f32 %v3018_v39, %v1043_v4  ;;  %v1045_v32 = vpop.f32.mrb[37].mxu0 }
 0x263   :  { %v1046_v15 = vpop.f32.mrb[38].mxu0 }
 0x264   :  { %v1076_v34 = vmax.f32 %v1044_v37, 0.0  ;;  %v1047_v36 = vadd.f32 %v3018_v39, %v1046_v15  ;;  %v1048_v3 = vpop.f32.mrb[39].mxu0  ;;  %1148 = vrot.lane.b32.xlu1 %v3087_v25, %s2406_s7  ;;  %1181 = vrot.lane.b32.xlu0 %v3087_v25, %s2407_s8  ;;  %v2360_v15 = vld [vmem:[%s3403_s11 + $0x8] sm:$0xff]  }
 0x266   :  { %v3095_v28 = vpack.c.bf16 %v1076_v34, %v1076_v34  ;;  %v1077_v55 = vmax.f32 %v1047_v36, 0.0 }
 0x268   :  { %1183 = vrot.lane.b32.xlu1 %v3095_v28, %s2407_s8  ;;  %1150 = vrot.lane.b32.xlu0 %v3095_v28, %s2406_s7  ;;  %v3101_v33 = vpack.c.bf16 %v1077_v55, %v1077_v55 }
 0x269   :  { %v1051_v42 = vpop.f32.mrb[40].mxu0 }
 0x26a   :  { %v1052_v31 = vadd.f32 %v3018_v39, %v1051_v42  ;;  %v1053_v46 = vpop.f32.mrb[41].mxu0 }
 0x26b   :  { %v1054_v47 = vpop.f32.mrb[42].mxu0 }
 0x26c   :  { %v1078_v49 = vmax.f32 %v1052_v31, 0.0  ;;  %v1055_v40 = vadd.f32 %v3018_v39, %v1054_v47  ;;  %v1056_v44 = vpop.f32.mrb[43].mxu0  ;;  %1152 = vrot.lane.b32.xlu1 %v3101_v33, %s2406_s7  ;;  %1185 = vrot.lane.b32.xlu0 %v3101_v33, %s2407_s8 }
 0x26e   :  { %v3109_v53 = vpack.c.bf16 %v1078_v49, %v1078_v49  ;;  %v1079_v51 = vmax.f32 %v1055_v40, 0.0 }
 0x270   :  { %1187 = vrot.lane.b32.xlu1 %v3109_v53, %s2407_s8  ;;  %1154 = vrot.lane.b32.xlu0 %v3109_v53, %s2406_s7  ;;  %v3115_v11 = vpack.c.bf16 %v1079_v51, %v1079_v51 }
 0x271   :  { %v1059_v59 = vpop.f32.mrb[44].mxu0 }
 0x272   :  { %v1060_v60 = vadd.f32 %v3018_v39, %v1059_v59  ;;  %v1061_v61 = vpop.f32.mrb[45].mxu0 }
 0x273   :  { %v1062_v22 = vpop.f32.mrb[46].mxu0 }
 0x274   :  { %v1080_v1 = vmax.f32 %v1060_v60, 0.0  ;;  %v1063_v63 = vadd.f32 %v3018_v39, %v1062_v22  ;;  %v1064_v0 = vpop.f32.mrb[47].mxu0  ;;  %1156 = vrot.lane.b32.xlu1 %v3115_v11, %s2406_s7  ;;  %1189 = vrot.lane.b32.xlu0 %v3115_v11, %s2407_s8 }
 0x276   :  { %v3123_v18 = vpack.c.bf16 %v1080_v1, %v1080_v1  ;;  %v1081_v24 = vmax.f32 %v1063_v63, 0.0 }
 0x278   :  { %1191 = vrot.lane.b32.xlu1 %v3123_v18, %s2407_s8  ;;  %1158 = vrot.lane.b32.xlu0 %v3123_v18, %s2406_s7  ;;  %v2178_v8 = vpack.c.bf16 %v1081_v24, %v1081_v24 }
 0x279   :  { %v3132_v39 = vpop.f32.mrb[48].mxu0 }
 0x27a   :  { %v3134_v14 = vpop.f32.mrb[49].mxu0 }
 0x27b   :  { %v3136_v13 = vpop.f32.mrb[50].mxu0 }
 0x27c   :  { %1160 = vrot.lane.b32.xlu1 %v2178_v8, %s2406_s7  ;;  %1193 = vrot.lane.b32.xlu0 %v2178_v8, %s2407_s8  ;;  %v3140_v16 = vpop.f32.mrb[51].mxu0 }
 0x281   :  { %v3142_v17 = vpop.f32.mrb[52].mxu0 }
 0x282   :  { %v3144_v50 = vpop.f32.mrb[53].mxu0 }
 0x283   :  { %v3146_v54 = vpop.f32.mrb[54].mxu0 }
 0x284   :  { %v3148_v21 = vpop.f32.mrb[55].mxu0 }
 0x289   :  { %v3150_v48 = vpop.f32.mrb[56].mxu0 }
 0x28a   :  { %v3152_v5 = vpop.f32.mrb[57].mxu0 }
 0x28b   :  { %v3154_v52 = vpop.f32.mrb[58].mxu0 }
 0x28c   :  { %v3156_v23 = vpop.f32.mrb[59].mxu0 }
 0x291   :  { %v3158_v58 = vpop.f32.mrb[60].mxu0 }
 0x292   :  { %v3160_v12 = vpop.f32.mrb[61].mxu0 }
 0x293   :  { %v3162_v38 = vpop.f32.mrb[62].mxu0 }
 0x294   :  { %v3164_v30 = vpop.f32.mrb[63].mxu0 }
 0x2b2   :  { %v1131_v19 = vpop.permute.xlu0 %1130 }
 0x2b3   :  { %v1198_v41 = vsel %vm1195_vm10, 0, %v1131_v19 }
 0x2b4   :  { %v1133_v45 = vpop.permute.xlu1 %1132 }
 0x2b5   :  { %v1201_v43 = vsel %vm1195_vm10, %v3029_v57, %v1133_v45 }
 0x2b6   :  { %v1166_v10 = vpop.permute.xlu0 %1165 }
 0x2b7   :  { %v1245_v35 = vsel %vm1243_vm11, %v1198_v41, %v1166_v10 }
 0x2ba   :  { %v1168_v26 = vpop.permute.xlu1 %1167  ;;  %v1135_v27 = vpop.permute.xlu0 %1134 }
 0x2bb   :  { %v1247_v4 = vsel %vm1243_vm11, %v1201_v43, %v1168_v26  ;;  %v2089_v37 = vcombine.low %v1166_v10, %v1168_v26  ;;  %v1204_v57 = vsel %vm1195_vm10, %v3032_v56, %v1135_v27 }
 0x2bc   :  { %v2088_v32 = vcombine.low %v1245_v35, %v1247_v4 }
 0x2bd   :  { %2115 = vmatprep.mubr.msk.bf16.mxu1 %vm1437_vm12, %v2089_v37 }
 0x2be   :  { %v1137_v34 = vpop.permute.xlu1 %1136  ;;  %v1170_v36 = vpop.permute.xlu0 %1169  ;;  %1499 = vmatmul.mubr.bf16.vlgmr.msra.gmra.mrb[16].mxu1 %v2088_v32 }
 0x2bf   :  { %2263 = vmatpush3.bf16.msra.mxu1 %v2359_v7  ;;  %v1207_v3 = vsel %vm1195_vm10, %v3042_v2, %v1137_v34  ;;  %v1249_v31 = vsel %vm1243_vm11, %v1204_v57, %v1170_v36 }
 0x2c0   :  { %2264 = vmatprep.subr.bf16.mxu1 %v2360_v15 }
 0x2c2   :  { %v1172_v55 = vpop.permute.xlu1 %1171  ;;  %v1139_v42 = vpop.permute.xlu0 %1138 }
 0x2c3   :  { %v1251_v46 = vsel %vm1243_vm11, %v1207_v3, %v1172_v55  ;;  %v2091_v47 = vcombine.low %v1170_v36, %v1172_v55  ;;  %2265 = vmatpush3.bf16.msra.mxu1 %v2360_v15  ;;  %v1210_v56 = vsel %vm1195_vm10, %v3048_v6, %v1139_v42 }
 0x2c4   :  { %v2090_v49 = vcombine.low %v1249_v31, %v1251_v46 }
 0x2c5   :  { %2116 = vmatprep.mubr.msk.bf16.mxu1 %vm1437_vm12, %v2091_v47 }
 0x2c6   :  { %v1141_v40 = vpop.permute.xlu1 %1140  ;;  %v1174_v44 = vpop.permute.xlu0 %1173  ;;  %1507 = vmatmul.mubr.bf16.gmra.mrb[20].mxu1 %v2090_v49 }
 0x2c7   :  { %v1213_v2 = vsel %vm1195_vm10, %v3056_v20, %v1141_v40  ;;  %v1253_v60 = vsel %vm1243_vm11, %v1210_v56, %v1174_v44 }
 0x2ca   :  { %v1176_v51 = vpop.permute.xlu1 %1175  ;;  %v1143_v59 = vpop.permute.xlu0 %1142 }
 0x2cb   :  { %v1255_v61 = vsel %vm1243_vm11, %v1213_v2, %v1176_v51  ;;  %v2093_v22 = vcombine.low %v1174_v44, %v1176_v51  ;;  %v1216_v24 = vsel %vm1195_vm10, %v3062_v62, %v1143_v59 }
 0x2cc   :  { %v2092_v1 = vcombine.low %v1253_v60, %v1255_v61 }
 0x2cd   :  { %2117 = vmatprep.mubr.msk.bf16.mxu1 %vm1437_vm12, %v2093_v22 }
 0x2ce   :  { %v1145_v63 = vpop.permute.xlu1 %1144  ;;  %v1178_v0 = vpop.permute.xlu0 %1177  ;;  %1515 = vmatmul.mubr.bf16.gmra.mrb[24].mxu1 %v2092_v1 }
 0x2cf   :  { %v1219_v6 = vsel %vm1195_vm10, %v3070_v9, %v1145_v63  ;;  %v1257_v8 = vsel %vm1243_vm11, %v1216_v24, %v1178_v0  ;;  %v2361_v24 = vld [vmem:[%s3403_s11 + $0x10] sm:$0xff]  }
 0x2d0   :  { %2266 = vmatprep.subr.bf16.mxu1 %v2361_v24 }
 0x2d1   :  { %2267 = vmatpush3.bf16.msra.mxu1 %v2361_v24 }
 0x2d2   :  { %v1180_v20 = vpop.permute.xlu1 %1179  ;;  %v1147_v7 = vpop.permute.xlu0 %1146 }
 0x2d3   :  { %v2095_v19 = vcombine.low %v1178_v0, %v1180_v20  ;;  %v1259_v45 = vsel %vm1243_vm11, %v1219_v6, %v1180_v20  ;;  %v1221_v26 = vsel %vm1195_vm10, 0, %v1147_v7 }
 0x2d4   :  { %v2094_v10 = vcombine.low %v1257_v8, %v1259_v45 }
 0x2d5   :  { %2118 = vmatprep.mubr.msk.bf16.mxu1 %vm1437_vm12, %v2095_v19 }
 0x2d6   :  { %v1149_v41 = vpop.permute.xlu1 %1148  ;;  %v1182_v43 = vpop.permute.xlu0 %1181  ;;  %1523 = vmatmul.mubr.bf16.gmra.mrb[28].mxu1 %v2094_v10 }
 0x2d7   :  { %v1224_v62 = vsel %vm1195_vm10, %v3082_v29, %v1149_v41  ;;  %v1261_v35 = vsel %vm1243_vm11, %v1221_v26, %v1182_v43 }
 0x2da   :  { %v1184_v27 = vpop.permute.xlu1 %1183  ;;  %v1151_v9 = vpop.permute.xlu0 %1150 }
 0x2db   :  { %v1263_v4 = vsel %vm1243_vm11, %v1224_v62, %v1184_v27  ;;  %v2097_v37 = vcombine.low %v1182_v43, %v1184_v27  ;;  %v1227_v36 = vsel %vm1195_vm10, %v3087_v25, %v1151_v9 }
 0x2dc   :  { %v2096_v32 = vcombine.low %v1261_v35, %v1263_v4 }
 0x2dd   :  { %2119 = vmatprep.mubr.msk.bf16.mxu1 %vm1437_vm12, %v2097_v37 }
 0x2de   :  { %v1153_v15 = vpop.permute.xlu1 %1152  ;;  %v1186_v34 = vpop.permute.xlu0 %1185  ;;  %1531 = vmatmul.mubr.bf16.gmra.mrb[32].mxu1 %v2096_v32 }
 0x2df   :  { %v1230_v57 = vsel %vm1195_vm10, %v3095_v28, %v1153_v15  ;;  %v1265_v55 = vsel %vm1243_vm11, %v1227_v36, %v1186_v34 }
 0x2e2   :  { %v1188_v29 = vpop.permute.xlu1 %1187  ;;  %v1155_v3 = vpop.permute.xlu0 %1154 }
 0x2e3   :  { %v1267_v42 = vsel %vm1243_vm11, %v1230_v57, %v1188_v29  ;;  %v2099_v31 = vcombine.low %v1186_v34, %v1188_v29  ;;  %v1233_v40 = vsel %vm1195_vm10, %v3101_v33, %v1155_v3 }
 0x2e4   :  { %v2098_v46 = vcombine.low %v1265_v55, %v1267_v42 }
 0x2e5   :  { %2120 = vmatprep.mubr.msk.bf16.mxu1 %vm1437_vm12, %v2099_v31 }
 0x2e6   :  { %v1157_v47 = vpop.permute.xlu1 %1156  ;;  %v1190_v49 = vpop.permute.xlu0 %1189  ;;  %1539 = vmatmul.mubr.bf16.gmra.mrb[36].mxu1 %v2098_v46 }
 0x2e7   :  { %v1236_v25 = vsel %vm1195_vm10, %v3109_v53, %v1157_v47  ;;  %v1269_v56 = vsel %vm1243_vm11, %v1233_v40, %v1190_v49 }
 0x2ea   :  { %v1192_v28 = vpop.permute.xlu1 %1191  ;;  %v1159_v44 = vpop.permute.xlu0 %1158 }
 0x2eb   :  { %v1271_v2 = vsel %vm1243_vm11, %v1236_v25, %v1192_v28  ;;  %v2101_v51 = vcombine.low %v1190_v49, %v1192_v28  ;;  %v1239_v53 = vsel %vm1195_vm10, %v3115_v11, %v1159_v44  ;;  %v3232_v11 = vld [vmem:[%s3401_s9] ss:$0 sm:$0xff] }
 0x2ec   :  { %v2100_v59 = vcombine.low %v1269_v56, %v1271_v2 }
 0x2ed   :  { %2121 = vmatprep.mubr.msk.bf16.mxu1 %vm1437_vm12, %v2101_v51 }
 0x2ee   :  { %v1161_v60 = vpop.permute.xlu1 %1160  ;;  %v1194_v61 = vpop.permute.xlu0 %1193  ;;  %1547 = vmatmul.mubr.bf16.gmra.mrb[40].mxu1 %v2100_v59 }
 0x2ef   :  { %v1242_v22 = vsel %vm1195_vm10, %v3123_v18, %v1161_v60  ;;  %v2103_v33 = vcombine.low %v1194_v61, %v1180_v20  ;;  %v1273_v63 = vsel %vm1243_vm11, %v1239_v53, %v1194_v61  ;;  %v2362_v18 = vld [vmem:[%s3403_s11 + $0x18] sm:$0xff]  }
 0x2f0   :  { %v1274_v1 = vsel %vm1243_vm11, %v1242_v22, %v1180_v20  ;;  %2268 = vmatprep.subr.bf16.mxu1 %v2362_v18 }
 0x2f1   :  { %2122 = vmatprep.mubr.msk.bf16.mxu1 %vm1437_vm12, %v2103_v33  ;;  %v2102_v0 = vcombine.low %v1273_v63, %v1274_v1  ;;  %2269 = vmatpush3.bf16.msra.mxu1 %v2362_v18 }
 0x2f6   :  { %1555 = vmatmul.mubr.bf16.gmra.mrb[44].mxu1 %v2102_v0 }
 0x391   :  { %v1500_v6 = vpop.f32.mrb[16].mxu1 }
 0x392   :  { %v1501_v20 = vadd.f32 %v3232_v11, %v1500_v6  ;;  %v1502_v7 = vpop.f32.mrb[17].mxu1 }
 0x393   :  { %v1503_v8 = vpop.f32.mrb[18].mxu1 }
 0x394   :  { %v1504_v19 = vadd.f32 %v3232_v11, %v1503_v8  ;;  %v1505_v45 = vpop.f32.mrb[19].mxu1  ;;  %v1563_v10 = vmax.f32 %v1501_v20, 0.0 }
 0x396   :  { %v1564_v41 = vmax.f32 %v1504_v19, 0.0 }
 0x398   :  { %v1593_v43 = vpack.c.bf16 %v1564_v41, %v1563_v10 }
 0x399   :  { %v1508_v26 = vpop.f32.mrb[20].mxu1 }
 0x39a   :  { %v1509_v62 = vadd.f32 %v3232_v11, %v1508_v26  ;;  %v1510_v27 = vpop.f32.mrb[21].mxu1  ;;  %2270 = vmatprep.mubr.msk.bf16.mxu1 %vm1633_vm13, %v1593_v43 }
 0x39b   :  { %v1511_v9 = vpop.f32.mrb[22].mxu1 }
 0x39c   :  { %v1512_v35 = vadd.f32 %v3232_v11, %v1511_v9  ;;  %v1513_v4 = vpop.f32.mrb[23].mxu1  ;;  %v1565_v37 = vmax.f32 %v1509_v62, 0.0 }
 0x39e   :  { %v1566_v32 = vmax.f32 %v1512_v35, 0.0 }
 0x3a0   :  { %v1594_v15 = vpack.c.bf16 %v1566_v32, %v1565_v37 }
 0x3a1   :  { %v1516_v34 = vpop.f32.mrb[24].mxu1 }
 0x3a2   :  { %v1517_v36 = vadd.f32 %v3232_v11, %v1516_v34  ;;  %v1518_v57 = vpop.f32.mrb[25].mxu1  ;;  %2271 = vmatmul.mubr.msk.bf16.vlgmr.msra.gmra.mrb[48].mxu1 %vm1633_vm13, %v1594_v15 }
 0x3a3   :  { %v1519_v29 = vpop.f32.mrb[26].mxu1 }
 0x3a4   :  { %v1520_v3 = vadd.f32 %v3232_v11, %v1519_v29  ;;  %v1521_v55 = vpop.f32.mrb[27].mxu1  ;;  %v1567_v42 = vmax.f32 %v1517_v36, 0.0 }
 0x3a6   :  { %v1568_v31 = vmax.f32 %v1520_v3, 0.0 }
 0x3a8   :  { %v1595_v46 = vpack.c.bf16 %v1568_v31, %v1567_v42 }
 0x3a9   :  { %v1524_v47 = vpop.f32.mrb[28].mxu1 }
 0x3aa   :  { %v1525_v49 = vadd.f32 %v3232_v11, %v1524_v47  ;;  %v1526_v40 = vpop.f32.mrb[29].mxu1  ;;  %2274 = vmatprep.mubr.msk.bf16.mxu1 %vm1633_vm13, %v1595_v46  ;;  %v3261_v46 = vld [vmem:[%s3404_s12] ss:$0 sm:$0xff]  ;;  %s2408_s12 = smov [#allocation3]  }
 0x3ab   :  { %v1527_v25 = vpop.f32.mrb[30].mxu1  ;;  %v3267_v40 = vstv %s3392_s0  ;;  %s1987_s29 = sshll.u32 %s2408_s12, 4  ;;  %s1988_s29 = int_to_ptr.vmem [resolvable:$true] %s1987_s29 }
 0x3ac   :  { %v1528_v28 = vadd.f32 %v3232_v11, %v1527_v25  ;;  %v1529_v44 = vpop.f32.mrb[31].mxu1  ;;  %v1569_v56 = vmax.f32 %v1525_v49, 0.0  ;;  %s2379_s14 = scalar_lea.vmem %s1988_s29, 2048  ;;  %p2384_p1 = scmp.lt.s32.totalorder %s1988_s29, %s1988_s29 }
 0x3ad   :  { %p2380_p0 = scmp.ne.s32.totalorder %s1988_s29, %s2379_s14  ;;  %p2385_p2 = scmp.lt.s32.totalorder %s2379_s14, %s2379_s14 }
 0x3ae   :  { %v1570_v2 = vmax.f32 %v1528_v28, 0.0 }
 0x3af   :  { %p2386_p3 = por %p2385_p2, %p2384_p1 }
 0x3b0   :  { %v1596_v51 = vpack.c.bf16 %v1570_v2, %v1569_v56 }
 0x3b1   :  { %v1532_v59 = vpop.f32.mrb[32].mxu1  ;;  %p2387_p4 = pnand %p2386_p3, %p2380_p0 }
 0x3b2   :  { %v1533_v60 = vadd.f32 %v3232_v11, %v1532_v59  ;;  %v1534_v61 = vpop.f32.mrb[33].mxu1  ;;  %2275 = vmatmul.mubr.msk.bf16.gmra.mrb[52].mxu1 %vm1633_vm13, %v1596_v51 }
 0x3b3   :  { %v1535_v22 = vpop.f32.mrb[34].mxu1 }
 0x3b4   :  { %v1536_v33 = vadd.f32 %v3232_v11, %v1535_v22  ;;  %v1537_v53 = vpop.f32.mrb[35].mxu1  ;;  %v1571_v1 = vmax.f32 %v1533_v60, 0.0 }
 0x3b6   :  { %v1572_v63 = vmax.f32 %v1536_v33, 0.0  ;;  %v2364_v33 = vld [vmem:[%s3393_s1] sm:$0xff] }
 0x3b8   :  { %v1597_v0 = vpack.c.bf16 %v1572_v63, %v1571_v1  ;;  %v2365_v63 = vld [vmem:[%s3393_s1 + $0x18] sm:$0xff] }
 0x3b9   :  { %v1540_v24 = vpop.f32.mrb[36].mxu1 }
 0x3ba   :  { %v1541_v18 = vadd.f32 %v3232_v11, %v1540_v24  ;;  %v1542_v6 = vpop.f32.mrb[37].mxu1  ;;  %2278 = vmatprep.mubr.msk.bf16.mxu1 %vm1633_vm13, %v1597_v0 }
 0x3bb   :  { %v1543_v20 = vpop.f32.mrb[38].mxu1 }
 0x3bc   :  { %v1544_v7 = vadd.f32 %v3232_v11, %v1543_v20  ;;  %v1545_v8 = vpop.f32.mrb[39].mxu1  ;;  %v1573_v19 = vmax.f32 %v1541_v18, 0.0  ;;  %v2366_v18 = vld [vmem:[%s3393_s1 + $0x8] sm:$0xff] }
 0x3be   :  { %v1574_v45 = vmax.f32 %v1544_v7, 0.0 }
 0x3c0   :  { %v1598_v10 = vpack.c.bf16 %v1574_v45, %v1573_v19 }
 0x3c1   :  { %v1548_v41 = vpop.f32.mrb[40].mxu1 }
 0x3c2   :  { %v1549_v43 = vadd.f32 %v3232_v11, %v1548_v41  ;;  %v1550_v26 = vpop.f32.mrb[41].mxu1  ;;  %2279 = vmatmul.mubr.msk.bf16.gmra.mrb[56].mxu1 %vm1633_vm13, %v1598_v10 }
 0x3c3   :  { %v1551_v62 = vpop.f32.mrb[42].mxu1 }
 0x3c4   :  { %v1552_v27 = vadd.f32 %v3232_v11, %v1551_v62  ;;  %v1553_v9 = vpop.f32.mrb[43].mxu1  ;;  %v1575_v35 = vmax.f32 %v1549_v43, 0.0 }
 0x3c6   :  { %v1576_v4 = vmax.f32 %v1552_v27, 0.0 }
 0x3c8   :  { %v1599_v37 = vpack.c.bf16 %v1576_v4, %v1575_v35 }
 0x3c9   :  { %v1556_v32 = vpop.f32.mrb[44].mxu1 }
 0x3ca   :  { %v1557_v15 = vadd.f32 %v3232_v11, %v1556_v32  ;;  %v1558_v34 = vpop.f32.mrb[45].mxu1  ;;  %2282 = vmatprep.mubr.msk.bf16.mxu1 %vm1633_vm13, %v1599_v37 }
 0x3cb   :  { %v1559_v36 = vpop.f32.mrb[46].mxu1 }
 0x3cc   :  { %v1560_v57 = vadd.f32 %v3232_v11, %v1559_v36  ;;  %v1561_v29 = vpop.f32.mrb[47].mxu1  ;;  %v1577_v3 = vmax.f32 %v1557_v15, 0.0  ;;  %v2368_v15 = vld [vmem:[%s3393_s1 + $0x20] sm:$0xff] }
 0x3ce   :  { %v1578_v55 = vmax.f32 %v1560_v57, 0.0  ;;  %v2369_v57 = vld [vmem:[%s3393_s1 + $0x38] sm:$0xff] }
 0x3d0   :  { %v1600_v42 = vpack.c.bf16 %v1578_v55, %v1577_v3  ;;  %v2370_v55 = vld [vmem:[%s3393_s1 + $0x28] sm:$0xff] }
 0x3d2   :  { %2283 = vmatmul.mubr.msk.bf16.gmra.mrb[60].mxu1 %vm1633_vm13, %v1600_v42 }
 0x475   :  { %v2272_v31 = vpop.f32.mrb[48].mxu1 }
 0x476   :  { %v1840_v47 = vadd.f32 %v3132_v39, %v2272_v31  ;;  %v1692_v49 = vpop.f32.mrb[49].mxu1 }
 0x477   :  { %v1832_v11 = vadd.f32 %v3134_v14, %v1692_v49  ;;  %v2273_v25 = vpop.f32.mrb[50].mxu1  ;;  %v2363_v14 = vld [vmem:[%s3393_s1 + $0x10] sm:$0xff] }
 0x478   :  { %v1903_v28 = vadd.f32 %v3261_v46, %v1840_v47  ;;  %v1843_v44 = vadd.f32 %v3136_v13, %v2273_v25  ;;  %v1695_v56 = vpop.f32.mrb[51].mxu1 }
 0x479   :  { %v1901_v2 = vadd.f32 %v3261_v46, %v1832_v11  ;;  %v1835_v51 = vadd.f32 %v3140_v16, %v1695_v56 }
 0x47a   :  { %v1920_v39 = vmul.f32 %v3267_v40, %v1903_v28  ;;  %v1904_v59 = vadd.f32 %v3261_v46, %v1843_v44 }
 0x47b   :  { %v1918_v60 = vmul.f32 %v3267_v40, %v1901_v2  ;;  %v1902_v61 = vadd.f32 %v3261_v46, %v1835_v51 }
 0x47c   :  { %v1936_v22 = vadd.f32 %v2363_v14, %v1920_v39  ;;  %v1921_v13 = vmul.f32 %v3267_v40, %v1904_v59 }
 0x47d   :  { %v1934_v16 = vadd.f32 %v2364_v33, %v1918_v60  ;;  %v1919_v53 = vmul.f32 %v3267_v40, %v1902_v61 }
 0x47e   :  { %v1952_v1 = vmax.f32 %v1936_v22, 0.0  ;;  %v1937_v0 = vadd.f32 %v2365_v63, %v1921_v13  ;;  %v2372_v13 = vld [vmem:[%s3393_s1 + $0x40] sm:$0xff] }
 0x47f   :  { %v1950_v24 = vmax.f32 %v1934_v16, 0.0  ;;  %v1935_v6 = vadd.f32 %v2366_v18, %v1919_v53  ;;  %v2373_v53 = vld [vmem:[%s3393_s1 + $0x58] sm:$0xff] }
 0x480   :  { %1968 = vst.msk [vmem:[#allocation3 + $0x10] sm:$0xff] %vm95_vm0, %v1952_v1  ;;  %v1953_v20 = vmax.f32 %v1937_v0, 0.0  ;;  %v2374_v0 = vld [vmem:[%s3393_s1 + $0x48] sm:$0xff] }
 0x481   :  { %1966 = vst.msk [vmem:[#allocation3] sm:$0xff] %vm95_vm0, %v1950_v24  ;;  %v1951_v7 = vmax.f32 %v1935_v6, 0.0 }
 0x482   :  { %1969 = vst.msk [vmem:[#allocation3 + $0x18] sm:$0xff] %vm95_vm0, %v1953_v20 }
 0x483   :  { %1967 = vst.msk [vmem:[#allocation3 + $0x8] sm:$0xff] %vm95_vm0, %v1951_v7 }
 0x485   :  { %v2276_v8 = vpop.f32.mrb[52].mxu1 }
 0x486   :  { %v1856_v19 = vadd.f32 %v3142_v17, %v2276_v8  ;;  %v1708_v45 = vpop.f32.mrb[53].mxu1 }
 0x487   :  { %v1848_v10 = vadd.f32 %v3144_v50, %v1708_v45  ;;  %v2277_v41 = vpop.f32.mrb[54].mxu1  ;;  %v2367_v50 = vld [vmem:[%s3393_s1 + $0x30] sm:$0xff] }
 0x488   :  { %v1907_v43 = vadd.f32 %v3261_v46, %v1856_v19  ;;  %v1859_v26 = vadd.f32 %v3146_v54, %v2277_v41  ;;  %v1711_v62 = vpop.f32.mrb[55].mxu1 }
 0x489   :  { %v1905_v27 = vadd.f32 %v3261_v46, %v1848_v10  ;;  %v1851_v9 = vadd.f32 %v3148_v21, %v1711_v62 }
 0x48a   :  { %v1924_v35 = vmul.f32 %v3267_v40, %v1907_v43  ;;  %v1908_v4 = vadd.f32 %v3261_v46, %v1859_v26 }
 0x48b   :  { %v1922_v37 = vmul.f32 %v3267_v40, %v1905_v27  ;;  %v1906_v17 = vadd.f32 %v3261_v46, %v1851_v9 }
 0x48c   :  { %v1940_v32 = vadd.f32 %v2367_v50, %v1924_v35  ;;  %v1925_v54 = vmul.f32 %v3267_v40, %v1908_v4 }
 0x48d   :  { %v1938_v21 = vadd.f32 %v2368_v15, %v1922_v37  ;;  %v1923_v34 = vmul.f32 %v3267_v40, %v1906_v17  ;;  %v2376_v37 = vld [vmem:[%s3393_s1 + $0x60] sm:$0xff]  ;;  %v2378_v15 = vld [vmem:[%s3393_s1 + $0x68] sm:$0xff] }
 0x48e   :  { %v1956_v36 = vmax.f32 %v1940_v32, 0.0  ;;  %v1941_v29 = vadd.f32 %v2369_v57, %v1925_v54  ;;  %v2377_v32 = vld [vmem:[%s3393_s1 + $0x78] sm:$0xff] }
 0x48f   :  { %v1954_v3 = vmax.f32 %v1938_v21, 0.0  ;;  %v1939_v42 = vadd.f32 %v2370_v55, %v1923_v34 }
 0x490   :  { %1972 = vst.msk [vmem:[#allocation3 + $0x30] sm:$0xff] %vm95_vm0, %v1956_v36  ;;  %v1957_v31 = vmax.f32 %v1941_v29, 0.0 }
 0x491   :  { %1970 = vst.msk [vmem:[#allocation3 + $0x20] sm:$0xff] %vm95_vm0, %v1954_v3  ;;  %v1955_v47 = vmax.f32 %v1939_v42, 0.0 }
 0x492   :  { %1973 = vst.msk [vmem:[#allocation3 + $0x38] sm:$0xff] %vm95_vm0, %v1957_v31 }
 0x493   :  { %1971 = vst.msk [vmem:[#allocation3 + $0x28] sm:$0xff] %vm95_vm0, %v1955_v47 }
 0x495   :  { %v2280_v49 = vpop.f32.mrb[56].mxu1 }
 0x496   :  { %v1872_v11 = vadd.f32 %v3150_v48, %v2280_v49  ;;  %v1724_v25 = vpop.f32.mrb[57].mxu1 }
 0x497   :  { %v1864_v28 = vadd.f32 %v3152_v5, %v1724_v25  ;;  %v2281_v44 = vpop.f32.mrb[58].mxu1  ;;  %v2371_v5 = vld [vmem:[%s3393_s1 + $0x50] sm:$0xff] }
 0x498   :  { %v1911_v56 = vadd.f32 %v3261_v46, %v1872_v11  ;;  %v1875_v2 = vadd.f32 %v3154_v52, %v2281_v44  ;;  %v1727_v51 = vpop.f32.mrb[59].mxu1 }
 0x499   :  { %v1909_v39 = vadd.f32 %v3261_v46, %v1864_v28  ;;  %v1867_v59 = vadd.f32 %v3156_v23, %v1727_v51 }
 0x49a   :  { %v1928_v60 = vmul.f32 %v3267_v40, %v1911_v56  ;;  %v1912_v61 = vadd.f32 %v3261_v46, %v1875_v2 }
 0x49b   :  { %v1926_v14 = vmul.f32 %v3267_v40, %v1909_v39  ;;  %v1910_v48 = vadd.f32 %v3261_v46, %v1867_v59 }
 0x49c   :  { %v1944_v22 = vadd.f32 %v2371_v5, %v1928_v60  ;;  %v1929_v52 = vmul.f32 %v3267_v40, %v1912_v61 }
 0x49d   :  { %v1942_v23 = vadd.f32 %v2372_v13, %v1926_v14  ;;  %v1927_v33 = vmul.f32 %v3267_v40, %v1910_v48 }
 0x49e   :  { %v1960_v16 = vmax.f32 %v1944_v22, 0.0  ;;  %v1945_v1 = vadd.f32 %v2373_v53, %v1929_v52 }
 0x49f   :  { %v1958_v63 = vmax.f32 %v1942_v23, 0.0  ;;  %v1943_v24 = vadd.f32 %v2374_v0, %v1927_v33 }
 0x4a0   :  { %1976 = vst.msk [vmem:[#allocation3 + $0x50] sm:$0xff] %vm95_vm0, %v1960_v16  ;;  %v1961_v18 = vmax.f32 %v1945_v1, 0.0 }
 0x4a1   :  { %1974 = vst.msk [vmem:[#allocation3 + $0x40] sm:$0xff] %vm95_vm0, %v1958_v63  ;;  %v1959_v6 = vmax.f32 %v1943_v24, 0.0 }
 0x4a2   :  { %1977 = vst.msk [vmem:[#allocation3 + $0x58] sm:$0xff] %vm95_vm0, %v1961_v18 }
 0x4a3   :  { %1975 = vst.msk [vmem:[#allocation3 + $0x48] sm:$0xff] %vm95_vm0, %v1959_v6 }
 0x4a5   :  { %v2284_v20 = vpop.f32.mrb[60].mxu1 }
 0x4a6   :  { %v1888_v7 = vadd.f32 %v3158_v58, %v2284_v20  ;;  %v1740_v8 = vpop.f32.mrb[61].mxu1 }
 0x4a7   :  { %v1880_v19 = vadd.f32 %v3160_v12, %v1740_v8  ;;  %v2285_v45 = vpop.f32.mrb[62].mxu1  ;;  %v2375_v12 = vld [vmem:[%s3393_s1 + $0x70] sm:$0xff] }
 0x4a8   :  { %v1915_v10 = vadd.f32 %v3261_v46, %v1888_v7  ;;  %v1891_v41 = vadd.f32 %v3162_v38, %v2285_v45  ;;  %v1743_v43 = vpop.f32.mrb[63].mxu1 }
 0x4a9   :  { %v1913_v26 = vadd.f32 %v3261_v46, %v1880_v19  ;;  %v1883_v62 = vadd.f32 %v3164_v30, %v1743_v43 }
 0x4aa   :  { %v1932_v27 = vmul.f32 %v3267_v40, %v1915_v10  ;;  %v1916_v9 = vadd.f32 %v3261_v46, %v1891_v41 }
 0x4ab   :  { %v1930_v35 = vmul.f32 %v3267_v40, %v1913_v26  ;;  %v1914_v58 = vadd.f32 %v3261_v46, %v1883_v62 }
 0x4ac   :  { %v1948_v4 = vadd.f32 %v2375_v12, %v1932_v27  ;;  %v1933_v38 = vmul.f32 %v3267_v40, %v1916_v9 }
 0x4ad   :  { %v1946_v30 = vadd.f32 %v2376_v37, %v1930_v35  ;;  %v1931_v17 = vmul.f32 %v3267_v40, %v1914_v58 }
 0x4ae   :  { %v1964_v50 = vmax.f32 %v1948_v4, 0.0  ;;  %v1949_v46 = vadd.f32 %v2377_v32, %v1933_v38 }
 0x4af   :  { %v1962_v54 = vmax.f32 %v1946_v30, 0.0  ;;  %v1947_v21 = vadd.f32 %v2378_v15, %v1931_v17 }
 0x4b0   :  { %1980 = vst.msk [vmem:[#allocation3 + $0x70] sm:$0xff] %vm95_vm0, %v1964_v50  ;;  %v1965_v34 = vmax.f32 %v1949_v46, 0.0 }
 0x4b1   :  { %1978 = vst.msk [vmem:[#allocation3 + $0x60] sm:$0xff] %vm95_vm0, %v1962_v54  ;;  %v1963_v40 = vmax.f32 %v1947_v21, 0.0 }
 0x4b2   :  { %1981 = vst.msk [vmem:[#allocation3 + $0x78] sm:$0xff] %vm95_vm0, %v1965_v34 }
 0x4b3   :  { %1979 = vst.msk [vmem:[#allocation3 + $0x68] sm:$0xff] %vm95_vm0, %v1963_v40 }
 0x4b4   :  { %2390 = shalt.err (!%p2387_p4)
}
 0x4b5   :  { %s2391_s15 = scalar_lea.hbm %s3405_s13, 2048 }
 0x4b6   :  { %p2392_p5 = scmp.ne.s32.totalorder %s3405_s13, %s2391_s15  ;;  %p2395_p6 = scmp.lt.u32.totalorder %s2391_s15, %s3405_s13 }
 0x4b8   :  { %p2397_p7 = pnand %p2395_p6, %p2392_p5 }
 0x4ba   :  { %2400 = shalt.err (!%p2397_p7)
}
 0x4bb   :  { %s2409_s3 = smov 128   ;;  %s2410_s7 = smov 8  }
 0x4bc   :  { %1993 = dma.vmem_to_hbm [thread:$0]  %s1988_s29, 2048, %s3405_s13, [#allocation4], %s2409_s3, %s2409_s3, %s2410_s7  }
 0x4bd   :  { %2401 = dma.done.wait [#allocation4], 2048  }
 0x4be   :  { %2402 = vsyncadd [#allocation4], 4294965248 }
 0x4bf   :  { %1997 = vsyncpa [#allocation4], 1 }

</bundles_post_ra>
